<compile_context>
chip_gen: v5e
topology: v5e:2x2
jax: 0.10.0
libtpu: 0.0.40
codegen_flags: <defaults>
</compile_context>

<pallas_src>
import functools

import numpy as np
import jax
import jax.numpy as jnp
from jax.experimental import pallas as pl
from jax.experimental.pallas import tpu as pltpu

_HALF_LOG_2PI = float(0.5 * np.log(2.0 * np.pi))


def _round_up(x, m):
    return ((x + m - 1) // m) * m


def _pick_tile(dim_pad, candidates):
    for c in candidates:
        if dim_pad % c == 0:
            return c
    return candidates[-1]


def _choose_tm(M):
    """Pick (tm, M_pad): tm multiple of 16, M_pad % tm == 0, >= 2 row tiles when
    possible (keeps both v7x TensorCores busy), bounded padding waste."""
    M16 = _round_up(M, 16)
    if M16 <= 128:
        return M16, M16
    if M16 >= 2048:
        for tm in (1024, 512, 256, 128):
            M_pad = _round_up(M16, tm)
            if (M_pad - M16) * 8 <= M_pad:          # <= 12.5% waste
                return tm, M_pad
    # Moderate M: split into two near-equal tiles (waste <= 16 rows).
    tm = _round_up(-(-M16 // 2), 16)
    return tm, 2 * tm


# ----------------------------------------------------------------------------
# Kernel 1: sample W (bf16, matmul layout) and b (f32), reduce lqw / lpw.
#   Inputs are already in the zero-padded (K_pad, N_pad) / (1, N_pad) layout.
#   Padded tail (mu = p = eps = 0) contributes a closed-form constant per
#   element that the host subtracts afterwards -> no in-kernel mask.
# ----------------------------------------------------------------------------
def _sample_loglike_kernel(prior_mu, inv_prior_sigma, log_prior_sigma,
                           wmu_ref, wp_ref, weps_ref,
                           bmu_ref, bp_ref, beps_ref,
                           w_ref, b_ref, lqw_ref, lpw_ref,
                           acc_q_ref, acc_p_ref):
    step = pl.program_id(0)
    tr, cols = wmu_ref.shape

    mu = wmu_ref[...]
    p = wp_ref[...]
    eps = weps_ref[...]

    # PyTorch F.softplus(beta=1, threshold=20): x if x > 20 else log1p(exp(x))
    std = 1e-6 + jnp.where(p > 20.0, p, jax.nn.softplus(p))
    w = mu + std * eps
    w_ref[...] = w.astype(w_ref.dtype)                 # bf16, matmul-ready

    # Posterior: (w - mu)/std == eps exactly -> no divide.
    lq = (-_HALF_LOG_2PI) - jnp.log(std) - 0.5 * (eps * eps)
    # Prior: multiply by precomputed 1/sigma instead of dividing.
    d = (w - prior_mu) * inv_prior_sigma
    lp = (-_HALF_LOG_2PI - log_prior_sigma) - 0.5 * (d * d)

    @pl.when(step == 0)
    def _():
        acc_q_ref[...] = jnp.zeros_like(acc_q_ref)
        acc_p_ref[...] = jnp.zeros_like(acc_p_ref)

    # Partial reduce to an (8, cols) accumulator: pure VPU adds each step; the
    # cross-lane reduction to a scalar happens once, in the last step.
    acc_q_ref[...] += jnp.sum(lq.reshape(tr // 8, 8, cols), axis=0)
    acc_p_ref[...] += jnp.sum(lp.reshape(tr // 8, 8, cols), axis=0)

    @pl.when(step == pl.num_programs(0) - 1)
    def _():
        bmu = bmu_ref[...]
        bp = bp_ref[...]
        beps = beps_ref[...]
        bstd = 1e-6 + jnp.where(bp > 20.0, bp, jax.nn.softplus(bp))
        b = bmu + bstd * beps
        b_ref[...] = b
        blq = (-_HALF_LOG_2PI) - jnp.log(bstd) - 0.5 * (beps * beps)
        bd = (b - prior_mu) * inv_prior_sigma
        blp = (-_HALF_LOG_2PI - log_prior_sigma) - 0.5 * (bd * bd)
        lqw_ref[0, 0] = jnp.sum(acc_q_ref[...]) + jnp.sum(blq)
        lpw_ref[0, 0] = jnp.sum(acc_p_ref[...]) + jnp.sum(blp)


def sample_weights_and_loglike(w_mu, w_p, w_eps, b_mu, b_p, b_eps,
                               prior_mu, prior_sigma, n_pad_elems):
    """All inputs already zero-padded: weights (K_pad, N_pad) f32, bias (1, N_pad)
    f32.  Returns (W bf16 (K_pad,N_pad), b f32 (1,N_pad), lqw, lpw)."""
    K_pad, N_pad = w_mu.shape
    tr = _pick_tile(K_pad, (512, 256, 128))
    while tr > 128 and tr * N_pad * 4 > 2 * 1024 * 1024:   # cap per-buffer size
        tr //= 2

    kernel = functools.partial(
        _sample_loglike_kernel, float(prior_mu),
        float(1.0 / prior_sigma), float(np.log(prior_sigma)))

    w_bf16, b_out, lqw_raw, lpw_raw = pl.pallas_call(
        kernel,
        grid=(K_pad // tr,),
        in_specs=[pl.BlockSpec((tr, N_pad), lambda i: (i, 0))] * 3
                 + [pl.BlockSpec((1, N_pad), lambda i: (0, 0))] * 3,
        out_specs=(pl.BlockSpec((tr, N_pad), lambda i: (i, 0)),
                   pl.BlockSpec((1, N_pad), lambda i: (0, 0)),
                   pl.BlockSpec((1, 1), lambda i: (0, 0),
                                memory_space=pltpu.SMEM),
                   pl.BlockSpec((1, 1), lambda i: (0, 0),
                                memory_space=pltpu.SMEM)),
        out_shape=(jax.ShapeDtypeStruct((K_pad, N_pad), jnp.bfloat16),
                   jax.ShapeDtypeStruct((1, N_pad), jnp.float32),
                   jax.ShapeDtypeStruct((1, 1), jnp.float32),
                   jax.ShapeDtypeStruct((1, 1), jnp.float32)),
        scratch_shapes=[pltpu.VMEM((8, N_pad), jnp.float32),
                        pltpu.VMEM((8, N_pad), jnp.float32)],
        compiler_params=pltpu.CompilerParams(
            dimension_semantics=("arbitrary",),
            vmem_limit_bytes=32 * 1024 * 1024),
        cost_estimate=pl.CostEstimate(
            flops=12 * K_pad * N_pad,
            transcendentals=3 * K_pad * N_pad,
            bytes_accessed=K_pad * N_pad * (3 * 4 + 2)),
    )(w_mu, w_p, w_eps, b_mu, b_p, b_eps)

    # Closed-form contribution of the zero-padded tail (mu = p = eps = 0),
    # removed on the host instead of per-element masking in the kernel.
    pad_std = jnp.float32(1e-6) + jax.nn.softplus(jnp.float32(0.0))
    lq_pad_per = jnp.float32(-_HALF_LOG_2PI) - jnp.log(pad_std)
    d0 = jnp.float32(0.0 - prior_mu) * jnp.float32(1.0 / prior_sigma)
    lp_pad_per = jnp.float32(-_HALF_LOG_2PI - np.log(prior_sigma)) - 0.5 * d0 * d0
    lqw = lqw_raw[0, 0] - jnp.float32(n_pad_elems) * lq_pad_per
    lpw = lpw_raw[0, 0] - jnp.float32(n_pad_elems) * lp_pad_per
    return w_bf16, b_out, lqw, lpw


# ----------------------------------------------------------------------------
# Kernel 2: tiled matmul + bias (the conv hot path on im2col patches).
#   out[M_pad, N_pad] = patches[M_pad, K_pad] @ w[K_pad, N_pad] + bias[1, N_pad]
# bf16 MXU inputs, f32 accumulation in VMEM scratch, pl.when init/finalize.
# ----------------------------------------------------------------------------
def _matmul_bias_kernel(p_ref, w_ref, b_ref, o_ref, acc_ref):
    k = pl.program_id(2)

    @pl.when(k == 0)
    def _():
        acc_ref[...] = jnp.zeros_like(acc_ref)

    acc_ref[...] += jnp.dot(p_ref[...], w_ref[...],
                            preferred_element_type=jnp.float32)

    @pl.when(k == pl.num_programs(2) - 1)
    def _():
        o_ref[...] = (acc_ref[...] + b_ref[...]).astype(o_ref.dtype)


def conv_matmul(patches_bf16, w_bf16, bias_f32):
    """patches: (M, K_pad) bf16, w: (K_pad, N_pad) bf16, bias: (1, N_pad) f32.
    Returns padded (M_pad, N_pad) f32 output (rows >= M are padding)."""
    M, K_pad = patches_bf16.shape
    K2, N_pad = w_bf16.shape
    assert K_pad == K2 and K_pad % 128 == 0 and N_pad % 128 == 0

    tm, M_pad = _choose_tm(M)
    tk = _pick_tile(K_pad, (512, 256, 128))   # multiples of 256 preferred (v6e/v7x MXU)
    tn = _pick_tile(N_pad, (512, 256, 128))
    if M_pad > M:
        patches_bf16 = jnp.pad(patches_bf16, ((0, M_pad - M), (0, 0)))

    grid = (M_pad // tm, N_pad // tn, K_pad // tk)
    out = pl.pallas_call(
        _matmul_bias_kernel,
        grid=grid,
        in_specs=[pl.BlockSpec((tm, tk), lambda i, j, k: (i, k)),
                  pl.BlockSpec((tk, tn), lambda i, j, k: (k, j)),
                  pl.BlockSpec((1, tn), lambda i, j, k: (0, j))],
        out_specs=pl.BlockSpec((tm, tn), lambda i, j, k: (i, j)),
        out_shape=jax.ShapeDtypeStruct((M_pad, N_pad), jnp.float32),
        scratch_shapes=[pltpu.VMEM((tm, tn), jnp.float32)],
        compiler_params=pltpu.CompilerParams(
            dimension_semantics=("parallel", "parallel", "arbitrary"),
            vmem_limit_bytes=32 * 1024 * 1024),
        cost_estimate=pl.CostEstimate(
            flops=2 * M_pad * K_pad * N_pad,
            transcendentals=0,
            bytes_accessed=(M_pad * K_pad * 2 + K_pad * N_pad * 2
                            + M_pad * N_pad * 4 + N_pad * 4)),
    )(patches_bf16, w_bf16, bias_f32)
    return out


# ----------------------------------------------------------------------------
# Layout helpers
# ----------------------------------------------------------------------------
def _oihw_to_kn_padded(a, k_pad, n_pad):
    """(co, ci, kh, kw) f32 -> zero-padded (K_pad, N_pad) in (kh,kw,ci) x co order."""
    co, ci, kh, kw = a.shape
    k = kh * kw * ci
    a_kn = jnp.transpose(a, (2, 3, 1, 0)).reshape(k, co)
    return jnp.pad(a_kn, ((0, k_pad - k), (0, n_pad - co)))


def _im2col_nhwc_bf16(x_nchw, kh, kw, k_pad):
    """NCHW input -> bf16 NHWC im2col patches (B*OH*OW, K_pad), VALID, stride 1.
    Built directly in bf16; the K zero-padding is folded into the concatenate."""
    B, C, H, W = x_nchw.shape
    oh, ow = H - kh + 1, W - kw + 1
    x = jnp.transpose(x_nchw.astype(jnp.bfloat16), (0, 2, 3, 1))   # (B,H,W,C)
    slabs = [x[:, dy:dy + oh, dx:dx + ow, :]
             for dy in range(kh) for dx in range(kw)]              # (B,OH,OW,C)
    k = kh * kw * C
    if k_pad > k:
        slabs.append(jnp.zeros((B, oh, ow, k_pad - k), jnp.bfloat16))
    patches = jnp.concatenate(slabs, axis=-1).reshape(B * oh * ow, k_pad)
    return patches, oh, ow


# ----------------------------------------------------------------------------
# jit-compiled forward implementation
# ----------------------------------------------------------------------------
def _forward_impl(X, W_mu_kn, W_p_kn, b_mu_pad, b_p_pad, eps_W, eps_b, *,
                  kh, kw, k_pad, n_pad, n_out, n_pad_elems, prior_mu, prior_sigma):
    # --- one fused Pallas call: sample W (bf16, matmul layout) and b,
    #     and reduce lqw / lpw over both -----------------------------------
    eps_w_kn = _oihw_to_kn_padded(eps_W, k_pad, n_pad)
    eps_b_pad = jnp.pad(eps_b, (0, n_pad - n_out)).reshape(1, n_pad)
    w_bf16, b_f32, lqw, lpw = sample_weights_and_loglike(
        W_mu_kn, W_p_kn, eps_w_kn, b_mu_pad, b_p_pad, eps_b_pad,
        prior_mu, prior_sigma, n_pad_elems)

    # --- conv2d: lane-dense bf16 NHWC im2col + tiled MXU matmul ------------
    patches, oh, ow = _im2col_nhwc_bf16(X, kh, kw, k_pad)
    out_pad = conv_matmul(patches, w_bf16, b_f32)       # (M_pad, N_pad) f32
    B = X.shape[0]
    M = B * oh * ow
    out_nhwc = out_pad[:M, :n_out].reshape(B, oh, ow, n_out)
    # Single relayout to the PyTorch NCHW output; NHWC consumers can skip it.
    output = jnp.transpose(out_nhwc, (0, 3, 1, 2))
    return output, lqw, lpw


_forward_jit = jax.jit(
    _forward_impl,
    static_argnames=("kh", "kw", "k_pad", "n_pad", "n_out",
                     "n_pad_elems", "prior_mu", "prior_sigma"))


# ----------------------------------------------------------------------------
# Module
# ----------------------------------------------------------------------------
class IsotropicGaussPrior:
    """Fixed isotropic Gaussian prior N(mu, sigma^2) (prior_class stand-in)."""

    def __init__(self, mu=0.0, sigma=0.1):
        self.mu = float(mu)
        self.sigma = float(sigma)

    def loglike(self, x):  # pure-JAX reference
        return jnp.sum(-_HALF_LOG_2PI - jnp.log(self.sigma)
                       - 0.5 * ((x - self.mu) / self.sigma) ** 2)


class BayesConvNormalq:
    """JAX/Pallas port of BayesConv_Normalq (stride=1, padding=0, dilation=1)."""

    def __init__(self, n_in_channels, n_out_channels, kernel_size, prior, key):
        self.n_in = n_in_channels
        self.n_out = n_out_channels
        self.kh = self.kw = kernel_size
        self.prior = prior
        k1, k2, k3, k4 = jax.random.split(key, 4)
        wshape = (n_out_channels, n_in_channels, kernel_size, kernel_size)
        self.W_mu = jax.random.uniform(k1, wshape, jnp.float32, -0.1, 0.1)
        self.W_p = jax.random.uniform(k2, wshape, jnp.float32, -3.0, -2.0)
        self.b_mu = jax.random.uniform(k3, (n_out_channels,), jnp.float32, -0.1, 0.1)
        self.b_p = jax.random.uniform(k4, (n_out_channels,), jnp.float32, -3.0, -2.0)

        # Matmul-ready, zero-padded parameter layouts built once at init so the
        # sampling kernel's bf16 output feeds the conv matmul directly.
        self.K = kernel_size * kernel_size * n_in_channels
        self.K_pad = _round_up(self.K, 128)
        self.N_pad = _round_up(n_out_channels, 128)
        self.W_mu_kn = _oihw_to_kn_padded(self.W_mu, self.K_pad, self.N_pad)
        self.W_p_kn = _oihw_to_kn_padded(self.W_p, self.K_pad, self.N_pad)
        self.b_mu_pad = jnp.pad(self.b_mu,
                                (0, self.N_pad - n_out_channels)).reshape(1, self.N_pad)
        self.b_p_pad = jnp.pad(self.b_p,
                               (0, self.N_pad - n_out_channels)).reshape(1, self.N_pad)
        self.n_pad_elems = ((self.K_pad * self.N_pad - self.K * n_out_channels)
                            + (self.N_pad - n_out_channels))

    # TODO(synk): deterministic eval path (sample=False) is not implemented; the
    # original module's self.out_bias is itself undefined in the PyTorch source.
    def forward(self, X, eps_W, eps_b):
        """Training / sample=True path. X: (B, Cin, H, W) NCHW float32."""
        return _forward_jit(
            X, self.W_mu_kn, self.W_p_kn, self.b_mu_pad, self.b_p_pad,
            eps_W, eps_b,
            kh=self.kh, kw=self.kw, k_pad=self.K_pad, n_pad=self.N_pad,
            n_out=self.n_out, n_pad_elems=self.n_pad_elems,
            prior_mu=self.prior.mu, prior_sigma=self.prior.sigma)


# ----------------------------------------------------------------------------
# Pure-JAX reference for verification
# ----------------------------------------------------------------------------
def _reference_forward(layer, X, eps_W, eps_b):
    std_w = 1e-6 + jax.nn.softplus(layer.W_p)
    std_b = 1e-6 + jax.nn.softplus(layer.b_p)
    W = layer.W_mu + std_w * eps_W
    b = layer.b_mu + std_b * eps_b
    out = jax.lax.conv_general_dilated(
        X, W, window_strides=(1, 1), padding='VALID',
        dimension_numbers=('NCHW', 'OIHW', 'NCHW'))
    out = out + b[None, :, None, None]

    def ll(x, mu, sigma):
        return jnp.sum(-_HALF_LOG_2PI - jnp.log(sigma) - 0.5 * ((x - mu) / sigma) ** 2)

    lqw = ll(W, layer.W_mu, std_w) + ll(b, layer.b_mu, std_b)
    lpw = layer.prior.loglike(W) + layer.prior.loglike(b)
    return out, lqw, lpw


if __name__ == "__main__":
    key = jax.random.PRNGKey(0)
    k_param, k_x, k_ew, k_eb = jax.random.split(key, 4)

    B, Cin, Cout, H, W, K = 2, 4, 8, 16, 16, 3
    prior = IsotropicGaussPrior(mu=0.0, sigma=0.1)
    layer = BayesConvNormalq(Cin, Cout, K, prior, k_param)

    X = jax.random.normal(k_x, (B, Cin, H, W), jnp.float32)
    eps_W = jax.random.normal(k_ew, (Cout, Cin, K, K), jnp.float32)
    eps_b = jax.random.normal(k_eb, (Cout,), jnp.float32)

    out, lqw, lpw = layer.forward(X, eps_W, eps_b)
    out = jax.block_until_ready(out)
    lqw = jax.block_until_ready(lqw)
    lpw = jax.block_until_ready(lpw)

    ref_out, ref_lqw, ref_lpw = _reference_forward(layer, X, eps_W, eps_b)
    assert out.shape == (B, Cout, H - K + 1, W - K + 1)
    # bf16 MXU inputs with f32 accumulation -> compare against the f32 reference
    # with a bf16-appropriate tolerance; log-likelihoods are pure f32 (the
    # closed-form pad-tail subtraction adds only ~1e-2 absolute error).
    np.testing.assert_allclose(np.asarray(out), np.asarray(ref_out),
                               rtol=2e-2, atol=2e-2)
    np.testing.assert_allclose(float(lqw), float(ref_lqw), rtol=1e-3, atol=5e-2)
    np.testing.assert_allclose(float(lpw), float(ref_lpw), rtol=1e-3, atol=5e-2)

    print("KERNEL_OK")
</pallas_src>

<mosaic_0001>
module attributes {stable_mosaic.version = 11 : i64} {
  func.func @_sample_loglike_kernel(%arg0: i32, %arg1: memref<128x128xf32, #tpu.memory_space<vmem>>, %arg2: memref<128x128xf32, #tpu.memory_space<vmem>>, %arg3: memref<128x128xf32, #tpu.memory_space<vmem>>, %arg4: memref<1x128xf32, #tpu.memory_space<vmem>>, %arg5: memref<1x128xf32, #tpu.memory_space<vmem>>, %arg6: memref<1x128xf32, #tpu.memory_space<vmem>>, %arg7: memref<128x128xbf16, #tpu.memory_space<vmem>>, %arg8: memref<1x128xf32, #tpu.memory_space<vmem>>, %arg9: memref<1x1xf32, #tpu.memory_space<smem>>, %arg10: memref<1x1xf32, #tpu.memory_space<smem>>, %arg11: memref<8x128xf32, #tpu.memory_space<vmem>>, %arg12: memref<8x128xf32, #tpu.memory_space<vmem>>) attributes {dimension_semantics = [#tpu.dimension_semantics<arbitrary>], iteration_bounds = array<i64: 1>, scalar_prefetch = 0 : i64, scratch_operands = 2 : i64, tpu.core_type = #tpu.core_type<tc>, window_params = [{transform_indices = @transform_0, window_bounds = array<i64: 128, 128>}, {transform_indices = @transform_1, window_bounds = array<i64: 128, 128>}, {transform_indices = @transform_2, window_bounds = array<i64: 128, 128>}, {pipeline_mode = #tpu.pipeline_mode<synchronous>, transform_indices = @transform_3, window_bounds = array<i64: 1, 128>}, {pipeline_mode = #tpu.pipeline_mode<synchronous>, transform_indices = @transform_4, window_bounds = array<i64: 1, 128>}, {pipeline_mode = #tpu.pipeline_mode<synchronous>, transform_indices = @transform_5, window_bounds = array<i64: 1, 128>}, {transform_indices = @transform_6, window_bounds = array<i64: 128, 128>}, {pipeline_mode = #tpu.pipeline_mode<synchronous>, transform_indices = @transform_7, window_bounds = array<i64: 1, 128>}, {transform_indices = @transform_8, window_bounds = array<i64: 1, 1>}, {transform_indices = @transform_9, window_bounds = array<i64: 1, 1>}]} {
    %c0 = arith.constant 0 : index
    %c0_0 = arith.constant 0 : index
    %0 = vector.load %arg1[%c0, %c0_0] : memref<128x128xf32, #tpu.memory_space<vmem>>, vector<128x128xf32>
    %c0_1 = arith.constant 0 : index
    %c0_2 = arith.constant 0 : index
    %1 = vector.load %arg2[%c0_1, %c0_2] : memref<128x128xf32, #tpu.memory_space<vmem>>, vector<128x128xf32>
    %c0_3 = arith.constant 0 : index
    %c0_4 = arith.constant 0 : index
    %2 = vector.load %arg3[%c0_3, %c0_4] : memref<128x128xf32, #tpu.memory_space<vmem>>, vector<128x128xf32>
    %cst = arith.constant 2.000000e+01 : f32
    %3 = vector.broadcast %cst : f32 to vector<128x128xf32>
    %4 = arith.cmpf ogt, %1, %3 : vector<128x128xf32>
    %cst_5 = arith.constant 0.000000e+00 : f32
    %5 = vector.broadcast %cst_5 : f32 to vector<128x128xf32>
    %6 = arith.maximumf %1, %5 : vector<128x128xf32>
    %7 = vector.broadcast %cst_5 : f32 to vector<128x128xf32>
    %8 = arith.subf %1, %7 : vector<128x128xf32>
    %9 = arith.cmpf one, %8, %8 : vector<128x128xf32>
    %10 = vector.broadcast %cst_5 : f32 to vector<128x128xf32>
    %11 = arith.addf %1, %10 : vector<128x128xf32>
    %12 = math.absf %8 : vector<128x128xf32>
    %cst_6 = arith.constant 0.000000e+00 : f32
    %13 = vector.broadcast %cst_6 : f32 to vector<128x128xf32>
    %14 = arith.subf %13, %12 : vector<128x128xf32>
    %15 = math.exp %14 : vector<128x128xf32>
    %16 = math.log1p %15 : vector<128x128xf32>
    %17 = arith.addf %6, %16 : vector<128x128xf32>
    %18 = arith.select %9, %11, %17 : vector<128x128xi1>, vector<128x128xf32>
    %19 = arith.select %4, %1, %18 : vector<128x128xi1>, vector<128x128xf32>
    %cst_7 = arith.constant 9.99999997E-7 : f32
    %20 = vector.broadcast %cst_7 : f32 to vector<128x128xf32>
    %21 = arith.addf %20, %19 : vector<128x128xf32>
    %22 = arith.mulf %21, %2 : vector<128x128xf32>
    %23 = arith.addf %0, %22 : vector<128x128xf32>
    %24 = arith.truncf %23 : vector<128x128xf32> to vector<128x128xbf16>
    %c0_8 = arith.constant 0 : index
    %c0_9 = arith.constant 0 : index
    %25 = vector.load %arg7[%c0_8, %c0_9] : memref<128x128xbf16, #tpu.memory_space<vmem>>, vector<128x128xbf16>
    tpu.vector_store %arg7[%c0_8, %c0_9], %24 {strides = array<i32>} : memref<128x128xbf16, #tpu.memory_space<vmem>>, vector<128x128xbf16>,
    %26 = math.log %21 : vector<128x128xf32>
    %cst_10 = arith.constant -0.918938517 : f32
    %27 = vector.broadcast %cst_10 : f32 to vector<128x128xf32>
    %28 = arith.subf %27, %26 : vector<128x128xf32>
    %29 = arith.mulf %2, %2 : vector<128x128xf32>
    %cst_11 = arith.constant 5.000000e-01 : f32
    %30 = vector.broadcast %cst_11 : f32 to vector<128x128xf32>
    %31 = arith.mulf %30, %29 : vector<128x128xf32>
    %32 = arith.subf %28, %31 : vector<128x128xf32>
    %cst_12 = arith.constant 0.000000e+00 : f32
    %33 = vector.broadcast %cst_12 : f32 to vector<128x128xf32>
    %34 = arith.subf %23, %33 : vector<128x128xf32>
    %cst_13 = arith.constant 1.000000e+01 : f32
    %35 = vector.broadcast %cst_13 : f32 to vector<128x128xf32>
    %36 = arith.mulf %34, %35 : vector<128x128xf32>
    %37 = arith.mulf %36, %36 : vector<128x128xf32>
    %cst_14 = arith.constant 5.000000e-01 : f32
    %38 = vector.broadcast %cst_14 : f32 to vector<128x128xf32>
    %39 = arith.mulf %38, %37 : vector<128x128xf32>
    %cst_15 = arith.constant 1.38364661 : f32
    %40 = vector.broadcast %cst_15 : f32 to vector<128x128xf32>
    %41 = arith.subf %40, %39 : vector<128x128xf32>
    %c0_i32 = arith.constant 0 : i32
    %42 = arith.cmpi eq, %arg0, %c0_i32 : i32
    %43 = arith.extui %42 : i1 to i32
    %c0_i32_16 = arith.constant 0 : i32
    %44 = arith.cmpi ne, %43, %c0_i32_16 : i32
    scf.if %44 {
      %cst_29 = arith.constant 0.000000e+00 : f32
      %58 = vector.broadcast %cst_29 : f32 to vector<8x128xf32>
      %c0_30 = arith.constant 0 : index
      %c0_31 = arith.constant 0 : index
      %59 = vector.load %arg11[%c0_30, %c0_31] : memref<8x128xf32, #tpu.memory_space<vmem>>, vector<8x128xf32>
      tpu.vector_store %arg11[%c0_30, %c0_31], %58 {strides = array<i32>} : memref<8x128xf32, #tpu.memory_space<vmem>>, vector<8x128xf32>,
      %cst_32 = arith.constant 0.000000e+00 : f32
      %60 = vector.broadcast %cst_32 : f32 to vector<8x128xf32>
      %c0_33 = arith.constant 0 : index
      %c0_34 = arith.constant 0 : index
      %61 = vector.load %arg12[%c0_33, %c0_34] : memref<8x128xf32, #tpu.memory_space<vmem>>, vector<8x128xf32>
      tpu.vector_store %arg12[%c0_33, %c0_34], %60 {strides = array<i32>} : memref<8x128xf32, #tpu.memory_space<vmem>>, vector<8x128xf32>,
    } else {
    }
    %c0_17 = arith.constant 0 : index
    %c0_18 = arith.constant 0 : index
    %45 = vector.load %arg11[%c0_17, %c0_18] : memref<8x128xf32, #tpu.memory_space<vmem>>, vector<8x128xf32>
    %46 = vector.shape_cast %32 : vector<128x128xf32> to vector<16x8x128xf32>
    %cst_19 = arith.constant dense<0.000000e+00> : vector<8x128xf32>
    %47 = vector.multi_reduction <add>, %46, %cst_19 [0] : vector<16x8x128xf32> to vector<8x128xf32>
    %48 = arith.addf %45, %47 : vector<8x128xf32>
    %c0_20 = arith.constant 0 : index
    %c0_21 = arith.constant 0 : index
    %49 = vector.load %arg11[%c0_20, %c0_21] : memref<8x128xf32, #tpu.memory_space<vmem>>, vector<8x128xf32>
    tpu.vector_store %arg11[%c0_20, %c0_21], %48 {strides = array<i32>} : memref<8x128xf32, #tpu.memory_space<vmem>>, vector<8x128xf32>,
    %c0_22 = arith.constant 0 : index
    %c0_23 = arith.constant 0 : index
    %50 = vector.load %arg12[%c0_22, %c0_23] : memref<8x128xf32, #tpu.memory_space<vmem>>, vector<8x128xf32>
    %51 = vector.shape_cast %41 : vector<128x128xf32> to vector<16x8x128xf32>
    %cst_24 = arith.constant dense<0.000000e+00> : vector<8x128xf32>
    %52 = vector.multi_reduction <add>, %51, %cst_24 [0] : vector<16x8x128xf32> to vector<8x128xf32>
    %53 = arith.addf %50, %52 : vector<8x128xf32>
    %c0_25 = arith.constant 0 : index
    %c0_26 = arith.constant 0 : index
    %54 = vector.load %arg12[%c0_25, %c0_26] : memref<8x128xf32, #tpu.memory_space<vmem>>, vector<8x128xf32>
    tpu.vector_store %arg12[%c0_25, %c0_26], %53 {strides = array<i32>} : memref<8x128xf32, #tpu.memory_space<vmem>>, vector<8x128xf32>,
    %c0_i32_27 = arith.constant 0 : i32
    %55 = arith.cmpi eq, %arg0, %c0_i32_27 : i32
    %56 = arith.extui %55 : i1 to i32
    %c0_i32_28 = arith.constant 0 : i32
    %57 = arith.cmpi ne, %56, %c0_i32_28 : i32
    scf.if %57 {
      %c0_29 = arith.constant 0 : index
      %c0_30 = arith.constant 0 : index
      %58 = vector.load %arg4[%c0_29, %c0_30] : memref<1x128xf32, #tpu.memory_space<vmem>>, vector<1x128xf32>
      %c0_31 = arith.constant 0 : index
      %c0_32 = arith.constant 0 : index
      %59 = vector.load %arg5[%c0_31, %c0_32] : memref<1x128xf32, #tpu.memory_space<vmem>>, vector<1x128xf32>
      %c0_33 = arith.constant 0 : index
      %c0_34 = arith.constant 0 : index
      %60 = vector.load %arg6[%c0_33, %c0_34] : memref<1x128xf32, #tpu.memory_space<vmem>>, vector<1x128xf32>
      %cst_35 = arith.constant 2.000000e+01 : f32
      %61 = vector.broadcast %cst_35 : f32 to vector<1x128xf32>
      %62 = arith.cmpf ogt, %59, %61 : vector<1x128xf32>
      %cst_36 = arith.constant 0.000000e+00 : f32
      %63 = vector.broadcast %cst_36 : f32 to vector<1x128xf32>
      %64 = arith.maximumf %59, %63 : vector<1x128xf32>
      %65 = vector.broadcast %cst_36 : f32 to vector<1x128xf32>
      %66 = arith.subf %59, %65 : vector<1x128xf32>
      %67 = arith.cmpf one, %66, %66 : vector<1x128xf32>
      %68 = vector.broadcast %cst_36 : f32 to vector<1x128xf32>
      %69 = arith.addf %59, %68 : vector<1x128xf32>
      %70 = math.absf %66 : vector<1x128xf32>
      %cst_37 = arith.constant 0.000000e+00 : f32
      %71 = vector.broadcast %cst_37 : f32 to vector<1x128xf32>
      %72 = arith.subf %71, %70 : vector<1x128xf32>
      %73 = math.exp %72 : vector<1x128xf32>
      %74 = math.log1p %73 : vector<1x128xf32>
      %75 = arith.addf %64, %74 : vector<1x128xf32>
      %76 = arith.select %67, %69, %75 : vector<1x128xi1>, vector<1x128xf32>
      %77 = arith.select %62, %59, %76 : vector<1x128xi1>, vector<1x128xf32>
      %cst_38 = arith.constant 9.99999997E-7 : f32
      %78 = vector.broadcast %cst_38 : f32 to vector<1x128xf32>
      %79 = arith.addf %78, %77 : vector<1x128xf32>
      %80 = arith.mulf %79, %60 : vector<1x128xf32>
      %81 = arith.addf %58, %80 : vector<1x128xf32>
      %c0_39 = arith.constant 0 : index
      %c0_40 = arith.constant 0 : index
      %82 = vector.load %arg8[%c0_39, %c0_40] : memref<1x128xf32, #tpu.memory_space<vmem>>, vector<1x128xf32>
      tpu.vector_store %arg8[%c0_39, %c0_40], %81 {strides = array<i32>} : memref<1x128xf32, #tpu.memory_space<vmem>>, vector<1x128xf32>,
      %83 = math.log %79 : vector<1x128xf32>
      %cst_41 = arith.constant -0.918938517 : f32
      %84 = vector.broadcast %cst_41 : f32 to vector<1x128xf32>
      %85 = arith.subf %84, %83 : vector<1x128xf32>
      %86 = arith.mulf %60, %60 : vector<1x128xf32>
      %cst_42 = arith.constant 5.000000e-01 : f32
      %87 = vector.broadcast %cst_42 : f32 to vector<1x128xf32>
      %88 = arith.mulf %87, %86 : vector<1x128xf32>
      %89 = arith.subf %85, %88 : vector<1x128xf32>
      %cst_43 = arith.constant 0.000000e+00 : f32
      %90 = vector.broadcast %cst_43 : f32 to vector<1x128xf32>
      %91 = arith.subf %81, %90 : vector<1x128xf32>
      %cst_44 = arith.constant 1.000000e+01 : f32
      %92 = vector.broadcast %cst_44 : f32 to vector<1x128xf32>
      %93 = arith.mulf %91, %92 : vector<1x128xf32>
      %94 = arith.mulf %93, %93 : vector<1x128xf32>
      %cst_45 = arith.constant 5.000000e-01 : f32
      %95 = vector.broadcast %cst_45 : f32 to vector<1x128xf32>
      %96 = arith.mulf %95, %94 : vector<1x128xf32>
      %cst_46 = arith.constant 1.38364661 : f32
      %97 = vector.broadcast %cst_46 : f32 to vector<1x128xf32>
      %98 = arith.subf %97, %96 : vector<1x128xf32>
      %c0_47 = arith.constant 0 : index
      %c0_48 = arith.constant 0 : index
      %99 = vector.load %arg11[%c0_47, %c0_48] : memref<8x128xf32, #tpu.memory_space<vmem>>, vector<8x128xf32>
      %100 = vector.shape_cast %99 : vector<8x128xf32> to vector<1x8x128xf32>
      %cst_49 = arith.constant dense<0.000000e+00> : vector<1xf32>
      %101 = vector.multi_reduction <add>, %100, %cst_49 [1, 2] : vector<1x8x128xf32> to vector<1xf32>
      %102 = vector.shape_cast %101 : vector<1xf32> to vector<1x1x1xf32>
      %103 = vector.extract %102[0, 0, 0] : f32 from vector<1x1x1xf32>
      %104 = vector.shape_cast %89 : vector<1x128xf32> to vector<1x1x128xf32>
      %cst_50 = arith.constant dense<0.000000e+00> : vector<1xf32>
      %105 = vector.multi_reduction <add>, %104, %cst_50 [1, 2] : vector<1x1x128xf32> to vector<1xf32>
      %106 = vector.shape_cast %105 : vector<1xf32> to vector<1x1x1xf32>
      %107 = vector.extract %106[0, 0, 0] : f32 from vector<1x1x1xf32>
      %108 = arith.addf %103, %107 : f32
      %c0_51 = arith.constant 0 : index
      %c0_52 = arith.constant 0 : index
      %109 = memref.load %arg9[%c0_51, %c0_52] : memref<1x1xf32, #tpu.memory_space<smem>>
      memref.store %108, %arg9[%c0_51, %c0_52] : memref<1x1xf32, #tpu.memory_space<smem>>
      %c0_53 = arith.constant 0 : index
      %c0_54 = arith.constant 0 : index
      %110 = vector.load %arg12[%c0_53, %c0_54] : memref<8x128xf32, #tpu.memory_space<vmem>>, vector<8x128xf32>
      %111 = vector.shape_cast %110 : vector<8x128xf32> to vector<1x8x128xf32>
      %cst_55 = arith.constant dense<0.000000e+00> : vector<1xf32>
      %112 = vector.multi_reduction <add>, %111, %cst_55 [1, 2] : vector<1x8x128xf32> to vector<1xf32>
      %113 = vector.shape_cast %112 : vector<1xf32> to vector<1x1x1xf32>
      %114 = vector.extract %113[0, 0, 0] : f32 from vector<1x1x1xf32>
      %115 = vector.shape_cast %98 : vector<1x128xf32> to vector<1x1x128xf32>
      %cst_56 = arith.constant dense<0.000000e+00> : vector<1xf32>
      %116 = vector.multi_reduction <add>, %115, %cst_56 [1, 2] : vector<1x1x128xf32> to vector<1xf32>
      %117 = vector.shape_cast %116 : vector<1xf32> to vector<1x1x1xf32>
      %118 = vector.extract %117[0, 0, 0] : f32 from vector<1x1x1xf32>
      %119 = arith.addf %114, %118 : f32
      %c0_57 = arith.constant 0 : index
      %c0_58 = arith.constant 0 : index
      %120 = memref.load %arg10[%c0_57, %c0_58] : memref<1x1xf32, #tpu.memory_space<smem>>
      memref.store %119, %arg10[%c0_57, %c0_58] : memref<1x1xf32, #tpu.memory_space<smem>>
    } else {
    }
    return
  }
  func.func @transform_0(%arg0: i32) -> (i32, i32) {
    %c0_i32 = arith.constant 0 : i32
    %c0_i32_0 = arith.constant 0 : i32
    return %arg0, %c0_i32 : i32, i32
  }
  func.func @transform_1(%arg0: i32) -> (i32, i32) {
    %c0_i32 = arith.constant 0 : i32
    %c0_i32_0 = arith.constant 0 : i32
    return %arg0, %c0_i32 : i32, i32
  }
  func.func @transform_2(%arg0: i32) -> (i32, i32) {
    %c0_i32 = arith.constant 0 : i32
    %c0_i32_0 = arith.constant 0 : i32
    return %arg0, %c0_i32 : i32, i32
  }
  func.func @transform_3(%arg0: i32) -> (i32, i32) {
    %c0_i32 = arith.constant 0 : i32
    %c0_i32_0 = arith.constant 0 : i32
    %c0_i32_1 = arith.constant 0 : i32
    return %c0_i32, %c0_i32_0 : i32, i32
  }
  func.func @transform_4(%arg0: i32) -> (i32, i32) {
    %c0_i32 = arith.constant 0 : i32
    %c0_i32_0 = arith.constant 0 : i32
    %c0_i32_1 = arith.constant 0 : i32
    return %c0_i32, %c0_i32_0 : i32, i32
  }
  func.func @transform_5(%arg0: i32) -> (i32, i32) {
    %c0_i32 = arith.constant 0 : i32
    %c0_i32_0 = arith.constant 0 : i32
    %c0_i32_1 = arith.constant 0 : i32
    return %c0_i32, %c0_i32_0 : i32, i32
  }
  func.func @transform_6(%arg0: i32) -> (i32, i32) {
    %c0_i32 = arith.constant 0 : i32
    %c0_i32_0 = arith.constant 0 : i32
    return %arg0, %c0_i32 : i32, i32
  }
  func.func @transform_7(%arg0: i32) -> (i32, i32) {
    %c0_i32 = arith.constant 0 : i32
    %c0_i32_0 = arith.constant 0 : i32
    %c0_i32_1 = arith.constant 0 : i32
    return %c0_i32, %c0_i32_0 : i32, i32
  }
  func.func @transform_8(%arg0: i32) -> (i32, i32) {
    %c0_i32 = arith.constant 0 : i32
    %c0_i32_0 = arith.constant 0 : i32
    %c0_i32_1 = arith.constant 0 : i32
    return %c0_i32, %c0_i32_0 : i32, i32
  }
  func.func @transform_9(%arg0: i32) -> (i32, i32) {
    %c0_i32 = arith.constant 0 : i32
    %c0_i32_0 = arith.constant 0 : i32
    %c0_i32_1 = arith.constant 0 : i32
    return %c0_i32, %c0_i32_0 : i32, i32
  }
}

module attributes {stable_mosaic.version = 11 : i64} {
  func.func @_matmul_bias_kernel(%arg0: i32, %arg1: i32, %arg2: i32, %arg3: memref<208x128xbf16, #tpu.memory_space<vmem>>, %arg4: memref<128x128xbf16, #tpu.memory_space<vmem>>, %arg5: memref<1x128xf32, #tpu.memory_space<vmem>>, %arg6: memref<208x128xf32, #tpu.memory_space<vmem>>, %arg7: memref<208x128xf32, #tpu.memory_space<vmem>>) attributes {dimension_semantics = [#tpu.dimension_semantics<parallel>, #tpu.dimension_semantics<parallel>, #tpu.dimension_semantics<arbitrary>], iteration_bounds = array<i64: 2, 1, 1>, scalar_prefetch = 0 : i64, scratch_operands = 1 : i64, tpu.core_type = #tpu.core_type<tc>, window_params = [{transform_indices = @transform_0, window_bounds = array<i64: 208, 128>}, {transform_indices = @transform_1, window_bounds = array<i64: 128, 128>}, {transform_indices = @transform_2, window_bounds = array<i64: 1, 128>}, {transform_indices = @transform_3, window_bounds = array<i64: 208, 128>}]} {
    %c0_i32 = arith.constant 0 : i32
    %0 = arith.cmpi eq, %arg2, %c0_i32 : i32
    %1 = arith.extui %0 : i1 to i32
    %c0_i32_0 = arith.constant 0 : i32
    %2 = arith.cmpi ne, %1, %c0_i32_0 : i32
    scf.if %2 {
      %cst_10 = arith.constant 0.000000e+00 : f32
      %12 = vector.broadcast %cst_10 : f32 to vector<208x128xf32>
      %c0_11 = arith.constant 0 : index
      %c0_12 = arith.constant 0 : index
      %13 = vector.load %arg7[%c0_11, %c0_12] : memref<208x128xf32, #tpu.memory_space<vmem>>, vector<208x128xf32>
      tpu.vector_store %arg7[%c0_11, %c0_12], %12 {strides = array<i32>} : memref<208x128xf32, #tpu.memory_space<vmem>>, vector<208x128xf32>,
    } else {
    }
    %c0 = arith.constant 0 : index
    %c0_1 = arith.constant 0 : index
    %3 = vector.load %arg7[%c0, %c0_1] : memref<208x128xf32, #tpu.memory_space<vmem>>, vector<208x128xf32>
    %c0_2 = arith.constant 0 : index
    %c0_3 = arith.constant 0 : index
    %4 = vector.load %arg3[%c0_2, %c0_3] : memref<208x128xbf16, #tpu.memory_space<vmem>>, vector<208x128xbf16>
    %c0_4 = arith.constant 0 : index
    %c0_5 = arith.constant 0 : index
    %5 = vector.load %arg4[%c0_4, %c0_5] : memref<128x128xbf16, #tpu.memory_space<vmem>>, vector<128x128xbf16>
    %cst = arith.constant dense<0.000000e+00> : vector<208x128xf32>
    %6 = tpu.matmul %4, %5, %cst {dimension_numbers = #tpu.dot_dimension_numbers<[1], [0], [0], [1], [0, 0, 1, 1], [], []>} : vector<208x128xbf16>, vector<128x128xbf16>, vector<208x128xf32> -> vector<208x128xf32>
    %7 = arith.addf %3, %6 : vector<208x128xf32>
    %c0_6 = arith.constant 0 : index
    %c0_7 = arith.constant 0 : index
    %8 = vector.load %arg7[%c0_6, %c0_7] : memref<208x128xf32, #tpu.memory_space<vmem>>, vector<208x128xf32>
    tpu.vector_store %arg7[%c0_6, %c0_7], %7 {strides = array<i32>} : memref<208x128xf32, #tpu.memory_space<vmem>>, vector<208x128xf32>,
    %c0_i32_8 = arith.constant 0 : i32
    %9 = arith.cmpi eq, %arg2, %c0_i32_8 : i32
    %10 = arith.extui %9 : i1 to i32
    %c0_i32_9 = arith.constant 0 : i32
    %11 = arith.cmpi ne, %10, %c0_i32_9 : i32
    scf.if %11 {
      %c0_10 = arith.constant 0 : index
      %c0_11 = arith.constant 0 : index
      %12 = vector.load %arg7[%c0_10, %c0_11] : memref<208x128xf32, #tpu.memory_space<vmem>>, vector<208x128xf32>
      %c0_12 = arith.constant 0 : index
      %c0_13 = arith.constant 0 : index
      %13 = vector.load %arg5[%c0_12, %c0_13] : memref<1x128xf32, #tpu.memory_space<vmem>>, vector<1x128xf32>
      %14 = vector.broadcast %13 : vector<1x128xf32> to vector<208x128xf32>
      %15 = arith.addf %12, %14 : vector<208x128xf32>
      %c0_14 = arith.constant 0 : index
      %c0_15 = arith.constant 0 : index
      %16 = vector.load %arg6[%c0_14, %c0_15] : memref<208x128xf32, #tpu.memory_space<vmem>>, vector<208x128xf32>
      tpu.vector_store %arg6[%c0_14, %c0_15], %15 {strides = array<i32>} : memref<208x128xf32, #tpu.memory_space<vmem>>, vector<208x128xf32>,
    } else {
    }
    return
  }
  func.func @transform_0(%arg0: i32, %arg1: i32, %arg2: i32) -> (i32, i32) {
    %c0_i32 = arith.constant 0 : i32
    return %arg0, %arg2 : i32, i32
  }
  func.func @transform_1(%arg0: i32, %arg1: i32, %arg2: i32) -> (i32, i32) {
    %c0_i32 = arith.constant 0 : i32
    return %arg2, %arg1 : i32, i32
  }
  func.func @transform_2(%arg0: i32, %arg1: i32, %arg2: i32) -> (i32, i32) {
    %c0_i32 = arith.constant 0 : i32
    %c0_i32_0 = arith.constant 0 : i32
    return %c0_i32, %arg1 : i32, i32
  }
  func.func @transform_3(%arg0: i32, %arg1: i32, %arg2: i32) -> (i32, i32) {
    %c0_i32 = arith.constant 0 : i32
    return %arg0, %arg1 : i32, i32
  }
}

</mosaic_0001>

<bundles_post_ra>
// kernel: _forward_impl.3
= control target key start
LH: loop header
LB: loop body
LE: loop exit
PB: predicated region body
PF: predicated region fallthrough
CT: control target
= control target key end

     0   :  { %s1014_s12 = smov 0   ;;  %s1016_s13 = smov 0   ;;  %s1152_s0 = inlined_call_operand.vmem [shape: bf16[416,128], index: 0, kind: input, shape index: {}]   ;;  %s1153_s1 = inlined_call_operand.vmem [shape: bf16[128,128], index: 1, kind: input, shape index: {}]   ;;  %s1154_s2 = inlined_call_operand.vmem [shape: f32[1,128], index: 2, kind: input, shape index: {}]   ;;  %s1155_s3 = inlined_call_operand.vmem [shape: f32[416,128], index: 3, kind: output, shape index: {}]  }
   0x1   :  { %s1018_s14 = smov 0  }
   0x2 LB: > { %s32_s15 = sadd.s32 1, %s988_s13  ;;  %p811_p0 = scmp.ge.s32.totalorder %s992_s14, 1  ;;  %s992_s14 = sphi %s1018_s14, %s13_s14   ;;  %s988_s13 = sphi %s1016_s13, %s1157_s13   ;;  %s984_s12 = sphi %s1014_s12, %s1156_s12  }
   0x3   : > { %p34_p1 = scmp.ge.s32.totalorder %s32_s15, 2  ;;  %p188_p2 = scmp.lt.s32.totalorder %s992_s14, 3 }
   0x5   : > { %s1159_s15 = smov (%p34_p1, %s32_s15), 0  ;;  %p189_p3 = pnand %p811_p0, %p188_p2 }
   0x6   : > { %s229_s24 = smul.u32 (!%p189_p3), 26, %s984_s12 }
   0x7   : > { %192 = sbr.rel (%p189_p3) target bundleno = 235 (0xeb), region = 32 }
   0x8   : > { %p230_p4 = scmp.lt.s32.totalorder (!%p189_p3), %s229_s24, 51 }
   0xc   : > { %v920_v0 = vld [vmem:[%s1153_s1 + $0x38] sm:$0xff]  ;;  %v919_v1 = vld [vmem:[%s1153_s1 + $0x30] sm:$0xff]  ;;  %v918_v2 = vld [vmem:[%s1153_s1 + $0x28] sm:$0xff]  ;;  %s1161_s24 = smov (!%p230_p4, %s229_s24), 51 }
   0xd   : > { %922 = vmatpush.bf16.msra.mxu2 %v920_v0  ;;  %923 = vmatpush.bf16.msra.mxu3 %v920_v0  ;;  %v917_v3 = vld [vmem:[%s1153_s1 + $0x20] sm:$0xff]  ;;  %v916_v4 = vld [vmem:[%s1153_s1 + $0x18] sm:$0xff]  ;;  %v915_v5 = vld [vmem:[%s1153_s1 + $0x10] sm:$0xff]  ;;  %s812_s4 = sshll.u32 %s1161_s24, 2  ;;  %s813_s10 = sshll.u32 %s1161_s24, 3 }
   0xe   : > { %483 = vmatpush.bf16.msra.mxu0 %v920_v0  ;;  %921 = vmatpush.bf16.msra.mxu1 %v920_v0  ;;  %v914_v6 = vld [vmem:[%s1153_s1 + $0x8] sm:$0xff]  ;;  %v913_v7 = vld [vmem:[%s1153_s1] sm:$0xff]  ;;  %s1065_s9 = scalar_lea.vmem %s1152_s0, %s812_s4  ;;  %s1091_s18 = scalar_lea.vmem %s1155_s3, %s813_s10 }
   0xf   : > { %v906_v8 = vld [vmem:[%s1065_s9 + $0x30] sm:$0xff]  ;;  %v900_v10 = vld [vmem:[%s1065_s9] sm:$0xff]  ;;  %v903_v11 = vld [vmem:[%s1065_s9 + $0x18] sm:$0xff] }
  0x10   : > { %v910_v9 = vld [vmem:[%s1065_s9 + $0x50] sm:$0xff]  ;;  %v907_v12 = vld [vmem:[%s1065_s9 + $0x38] sm:$0xff]  ;;  %v901_v14 = vld [vmem:[%s1065_s9 + $0x8] sm:$0xff] }
  0x11   : > { %925 = vmatpush.bf16.msra.mxu2 %v919_v1  ;;  %926 = vmatpush.bf16.msra.mxu3 %v919_v1  ;;  %v911_v13 = vld [vmem:[%s1065_s9 + $0x58] sm:$0xff]  ;;  %v904_v15 = vld [vmem:[%s1065_s9 + $0x20] sm:$0xff]  ;;  %v902_v18 = vld [vmem:[%s1065_s9 + $0x10] sm:$0xff] }
  0x12   : > { %484 = vmatpush.bf16.msra.mxu0 %v919_v1  ;;  %924 = vmatpush.bf16.msra.mxu1 %v919_v1  ;;  %v908_v16 = vld [vmem:[%s1065_s9 + $0x40] sm:$0xff]  ;;  %v905_v19 = vld [vmem:[%s1065_s9 + $0x28] sm:$0xff] }
  0x13   : > { %v912_v17 = vld [vmem:[%s1065_s9 + $0x60] sm:$0xff]  ;;  %v909_v20 = vld [vmem:[%s1065_s9 + $0x48] sm:$0xff] }
  0x14   : > { %v1084_v21 = vld [vmem:[%s1154_s2] ss:$0 sm:$0xff] }
  0x15   : > { %928 = vmatpush.bf16.msra.mxu2 %v918_v2  ;;  %929 = vmatpush.bf16.msra.mxu3 %v918_v2 }
  0x16   : > { %485 = vmatpush.bf16.msra.mxu0 %v918_v2  ;;  %927 = vmatpush.bf16.msra.mxu1 %v918_v2 }
  0x19   : > { %931 = vmatpush.bf16.msra.mxu2 %v917_v3  ;;  %932 = vmatpush.bf16.msra.mxu3 %v917_v3 }
  0x1a   : > { %486 = vmatpush.bf16.msra.mxu0 %v917_v3  ;;  %930 = vmatpush.bf16.msra.mxu1 %v917_v3 }
  0x1d   : > { %934 = vmatpush.bf16.msra.mxu2 %v916_v4  ;;  %935 = vmatpush.bf16.msra.mxu3 %v916_v4 }
  0x1e   : > { %487 = vmatpush.bf16.msra.mxu0 %v916_v4  ;;  %933 = vmatpush.bf16.msra.mxu1 %v916_v4 }
  0x21   : > { %937 = vmatpush.bf16.msra.mxu2 %v915_v5  ;;  %938 = vmatpush.bf16.msra.mxu3 %v915_v5 }
  0x22   : > { %488 = vmatpush.bf16.msra.mxu0 %v915_v5  ;;  %936 = vmatpush.bf16.msra.mxu1 %v915_v5 }
  0x25   : > { %940 = vmatpush.bf16.msra.mxu2 %v914_v6  ;;  %941 = vmatpush.bf16.msra.mxu3 %v914_v6 }
  0x26   : > { %489 = vmatpush.bf16.msra.mxu0 %v914_v6  ;;  %939 = vmatpush.bf16.msra.mxu1 %v914_v6 }
  0x29   : > { %943 = vmatpush.bf16.msra.mxu2 %v913_v7  ;;  %944 = vmatpush.bf16.msra.mxu3 %v913_v7 }
  0x2a   : > { %490 = vmatpush.bf16.msra.mxu0 %v913_v7  ;;  %942 = vmatpush.bf16.msra.mxu1 %v913_v7 }
  0x2c   : > { %521 = vmatmul.bf16.vlgmr.msra.gmra.mxu2 %v906_v8  ;;  %541 = vmatmul.bf16.vlgmr.msra.gmra.mxu3 %v910_v9 }
  0x2d   : > { %491 = vmatmul.bf16.vlgmr.msra.gmra.mxu0 %v900_v10  ;;  %506 = vmatmul.bf16.vlgmr.msra.gmra.mxu1 %v903_v11 }
  0x3c   : > { %526 = vmatmul.bf16.gmra.mxu2 %v907_v12  ;;  %546 = vmatmul.bf16.gmra.mxu3 %v911_v13 }
  0x3d   : > { %496 = vmatmul.bf16.gmra.mxu0 %v901_v14  ;;  %511 = vmatmul.bf16.gmra.mxu1 %v904_v15 }
  0x4c   : > { %531 = vmatmul.bf16.gmra.mxu2 %v908_v16  ;;  %551 = vmatmul.bf16.gmra.mxu3 %v912_v17 }
  0x4d   : > { %501 = vmatmul.bf16.gmra.mxu0 %v902_v18  ;;  %516 = vmatmul.bf16.gmra.mxu1 %v905_v19 }
  0x5c   : > { %536 = vmatmul.bf16.gmra.mxu2 %v909_v20 }
  0xaa   : > { %v492_v22 = vpop.f32.mrf.mxu0  ;;  %v507_v23 = vpop.f32.mrf.mxu1 }
  0xab   : > { %v642_v24 = vadd.f32 %v1084_v21, %v492_v22  ;;  %v648_v25 = vadd.f32 %v1084_v21, %v507_v23 }
  0xad   : > { %668 = vst [vmem:[%s1091_s18] sm:$0xff] %v642_v24 }
  0xae   : > { %674 = vst [vmem:[%s1091_s18 + $0x30] sm:$0xff] %v648_v25 }
  0xaf   : > { %v522_v26 = vpop.f32.mrf.mxu2  ;;  %v542_v27 = vpop.f32.mrf.mxu3 }
  0xb0   : > { %v654_v28 = vadd.f32 %v1084_v21, %v522_v26  ;;  %v662_v29 = vadd.f32 %v1084_v21, %v542_v27 }
  0xb2   : > { %680 = vst [vmem:[%s1091_s18 + $0x60] sm:$0xff] %v654_v28  ;;  %v494_v30 = vpop.f32.mrf.mxu0  ;;  %v509_v31 = vpop.f32.mrf.mxu1 }
  0xb3   : > { %688 = vst [vmem:[%s1091_s18 + $0xa0] sm:$0xff] %v662_v29  ;;  %v643_v32 = vadd.f32 %v1084_v21, %v494_v30  ;;  %v649_v33 = vadd.f32 %v1084_v21, %v509_v31 }
  0xb5   : > { %669 = vst [vmem:[%s1091_s18 + $0x8] sm:$0xff] %v643_v32 }
  0xb6   : > { %675 = vst [vmem:[%s1091_s18 + $0x38] sm:$0xff] %v649_v33 }
  0xb7   : > { %v524_v34 = vpop.f32.mrf.mxu2  ;;  %v544_v35 = vpop.f32.mrf.mxu3 }
  0xb8   : > { %v655_v36 = vadd.f32 %v1084_v21, %v524_v34  ;;  %v663_v37 = vadd.f32 %v1084_v21, %v544_v35 }
  0xba   : > { %681 = vst [vmem:[%s1091_s18 + $0x68] sm:$0xff] %v655_v36  ;;  %v497_v38 = vpop.f32.mrf.mxu0  ;;  %v512_v39 = vpop.f32.mrf.mxu1 }
  0xbb   : > { %689 = vst [vmem:[%s1091_s18 + $0xa8] sm:$0xff] %v663_v37  ;;  %v644_v40 = vadd.f32 %v1084_v21, %v497_v38  ;;  %v650_v41 = vadd.f32 %v1084_v21, %v512_v39 }
  0xbd   : > { %670 = vst [vmem:[%s1091_s18 + $0x10] sm:$0xff] %v644_v40 }
  0xbe   : > { %676 = vst [vmem:[%s1091_s18 + $0x40] sm:$0xff] %v650_v41 }
  0xbf   : > { %v527_v42 = vpop.f32.mrf.mxu2  ;;  %v547_v43 = vpop.f32.mrf.mxu3 }
  0xc0   : > { %v656_v44 = vadd.f32 %v1084_v21, %v527_v42  ;;  %v664_v45 = vadd.f32 %v1084_v21, %v547_v43 }
  0xc2   : > { %682 = vst [vmem:[%s1091_s18 + $0x70] sm:$0xff] %v656_v44  ;;  %v499_v46 = vpop.f32.mrf.mxu0  ;;  %v514_v47 = vpop.f32.mrf.mxu1 }
  0xc3   : > { %690 = vst [vmem:[%s1091_s18 + $0xb0] sm:$0xff] %v664_v45  ;;  %v645_v48 = vadd.f32 %v1084_v21, %v499_v46  ;;  %v651_v49 = vadd.f32 %v1084_v21, %v514_v47 }
  0xc5   : > { %671 = vst [vmem:[%s1091_s18 + $0x18] sm:$0xff] %v645_v48 }
  0xc6   : > { %677 = vst [vmem:[%s1091_s18 + $0x48] sm:$0xff] %v651_v49 }
  0xc7   : > { %v529_v50 = vpop.f32.mrf.mxu2  ;;  %v549_v51 = vpop.f32.mrf.mxu3 }
  0xc8   : > { %v657_v52 = vadd.f32 %v1084_v21, %v529_v50  ;;  %v665_v53 = vadd.f32 %v1084_v21, %v549_v51 }
  0xca   : > { %683 = vst [vmem:[%s1091_s18 + $0x78] sm:$0xff] %v657_v52  ;;  %v502_v54 = vpop.f32.mrf.mxu0  ;;  %v517_v55 = vpop.f32.mrf.mxu1 }
  0xcb   : > { %691 = vst [vmem:[%s1091_s18 + $0xb8] sm:$0xff] %v665_v53  ;;  %v646_v56 = vadd.f32 %v1084_v21, %v502_v54  ;;  %v652_v57 = vadd.f32 %v1084_v21, %v517_v55 }
  0xcd   : > { %672 = vst [vmem:[%s1091_s18 + $0x20] sm:$0xff] %v646_v56 }
  0xce   : > { %678 = vst [vmem:[%s1091_s18 + $0x50] sm:$0xff] %v652_v57 }
  0xcf   : > { %v532_v58 = vpop.f32.mrf.mxu2  ;;  %v552_v59 = vpop.f32.mrf.mxu3 }
  0xd0   : > { %v658_v60 = vadd.f32 %v1084_v21, %v532_v58  ;;  %v666_v61 = vadd.f32 %v1084_v21, %v552_v59 }
  0xd2   : > { %684 = vst [vmem:[%s1091_s18 + $0x80] sm:$0xff] %v658_v60  ;;  %v504_v62 = vpop.f32.mrf.mxu0  ;;  %v519_v63 = vpop.f32.mrf.mxu1 }
  0xd3   : > { %692 = vst [vmem:[%s1091_s18 + $0xc0] sm:$0xff] %v666_v61  ;;  %v647_v0 = vadd.f32 %v1084_v21, %v504_v62  ;;  %v653_v1 = vadd.f32 %v1084_v21, %v519_v63 }
  0xd5   : > { %673 = vst [vmem:[%s1091_s18 + $0x28] sm:$0xff] %v647_v0 }
  0xd6   : > { %679 = vst [vmem:[%s1091_s18 + $0x58] sm:$0xff] %v653_v1 }
  0xd7   : > { %v534_v2 = vpop.f32.mrf.mxu2  ;;  %v554_v3 = vpop.f32.mrf.mxu3 }
  0xd8   : > { %v659_v4 = vadd.f32 %v1084_v21, %v534_v2  ;;  %v667_v5 = vadd.f32 %v1084_v21, %v554_v3 }
  0xda   : > { %685 = vst [vmem:[%s1091_s18 + $0x88] sm:$0xff] %v659_v4 }
  0xdb   : > { %693 = vst [vmem:[%s1091_s18 + $0xc8] sm:$0xff] %v667_v5 }
  0xdf   : > { %v537_v6 = vpop.f32.mrf.mxu2 }
  0xe0   : > { %v660_v7 = vadd.f32 %v1084_v21, %v537_v6 }
  0xe2   : > { %686 = vst [vmem:[%s1091_s18 + $0x90] sm:$0xff] %v660_v7 }
  0xe7   : > { %v539_v8 = vpop.f32.mrf.mxu2 }
  0xe8   : > { %v661_v9 = vadd.f32 %v1084_v21, %v539_v8 }
  0xea   : > { %687 = vst [vmem:[%s1091_s18 + $0x98] sm:$0xff] %v661_v9 }
  0xeb PF: > { %s13_s14 = sadd.s32 1, %s992_s14   ;;  %s1156_s12 = smov %s988_s13 }
  0xec   : > { %p10_p5 = scmp.ge.s32.totalorder %s13_s14, 4   ;;  %s1157_s13 = smov %s1159_s15 }
  0xee   :  { %12 = sbr.rel (!%p10_p5) target bundleno = 2 (0x2), region = 76 }

// kernel: _forward_impl.2
= control target key start
LH: loop header
LB: loop body
LE: loop exit
PB: predicated region body
PF: predicated region fallthrough
CT: control target
= control target key end

     0   :  { %15 = vsyncpa [#allocation5], 0  ;;  %s1920_s0 = inlined_call_operand.vmem [shape: f32[128,128], index: 0, kind: input, shape index: {}]   ;;  %s1921_s1 = inlined_call_operand.vmem [shape: f32[128,128], index: 1, kind: input, shape index: {}]   ;;  %s1922_s2 = inlined_call_operand.vmem [shape: f32[128,128], index: 2, kind: input, shape index: {}]   ;;  %s1923_s3 = inlined_call_operand.vmem [shape: f32[1,128], index: 3, kind: input, shape index: {}]   ;;  %s1924_s4 = inlined_call_operand.vmem [shape: f32[1,128], index: 4, kind: input, shape index: {}]   ;;  %s1925_s5 = inlined_call_operand.vmem [shape: f32[1,128], index: 5, kind: input, shape index: {}]   ;;  %s1926_s6 = inlined_call_operand.vmem [shape: bf16[128,128], index: 6, kind: output, shape index: {0}]   ;;  %s1927_s7 = inlined_call_operand.vmem [shape: f32[1,128], index: 7, kind: output, shape index: {1}]   ;;  %s1928_s8 = inlined_call_operand.hbm [shape: f32[1,1], index: 8, kind: output, shape index: {2}]   ;;  %s1929_s9 = inlined_call_operand.hbm [shape: f32[1,1], index: 9, kind: output, shape index: {3}]  }
   0x1   :  { %v1045_v0 = vld [vmem:[%s1921_s1] sm:$0xff]  ;;  %v1050_v1 = vld [vmem:[%s1921_s1 + $0x8] sm:$0xff] }
   0x2   :  { %16 = vsyncpa [#allocation7], 0  ;;  %v1055_v2 = vld [vmem:[%s1921_s1 + $0x10] sm:$0xff]  ;;  %v1060_v3 = vld [vmem:[%s1921_s1 + $0x18] sm:$0xff]  ;;  %v141_v11 = vand.u32 2147483647, %v1045_v0 }
   0x3   :  { %v1065_v4 = vld [vmem:[%s1921_s1 + $0x20] sm:$0xff]  ;;  %v1070_v5 = vld [vmem:[%s1921_s1 + $0x28] sm:$0xff]  ;;  %v1075_v6 = vld [vmem:[%s1921_s1 + $0x30] sm:$0xff]  ;;  %v142_v12 = vand.u32 2147483647, %v1050_v1  ;;  %v1971_v19 = vmov 0 }
   0x4   :  { %v1080_v7 = vld [vmem:[%s1921_s1 + $0x38] sm:$0xff]  ;;  %v1086_v9 = vld [vmem:[%s1921_s1 + $0x40] sm:$0xff]  ;;  %v1091_v10 = vld [vmem:[%s1921_s1 + $0x48] sm:$0xff]  ;;  %v143_v15 = vand.u32 2147483647, %v1055_v2  ;;  %v157_v29 = vsub.f32 0.0, %v141_v11 }
   0x5   :  { %v1098_v13 = vld [vmem:[%s1921_s1 + $0x50] sm:$0xff]  ;;  %v1103_v14 = vld [vmem:[%s1921_s1 + $0x58] sm:$0xff]  ;;  %v144_v16 = vand.u32 2147483647, %v1060_v3  ;;  %v1110_v17 = vld [vmem:[%s1921_s1 + $0x60] sm:$0xff]  ;;  %v158_v30 = vsub.f32 0.0, %v142_v12 }
   0x6   :  { %v145_v21 = vand.u32 2147483647, %v1065_v4  ;;  %v1119_v22 = vld [vmem:[%s1921_s1 + $0x68] sm:$0xff]  ;;  %v146_v26 = vand.u32 2147483647, %v1070_v5  ;;  %v1130_v31 = vld [vmem:[%s1921_s1 + $0x70] sm:$0xff] }
   0x7   :  { %v147_v27 = vand.u32 2147483647, %v1075_v6  ;;  %v148_v28 = vand.u32 2147483647, %v1080_v7  ;;  %v149_v32 = vand.u32 2147483647, %v1086_v9 }
   0x8   :  { %v150_v33 = vand.u32 2147483647, %v1091_v10  ;;  %v159_v34 = vsub.f32 0.0, %v143_v15  ;;  %v160_v35 = vsub.f32 0.0, %v144_v16  ;;  %v1137_v36 = vld [vmem:[%s1921_s1 + $0x78] sm:$0xff]  ;;  %v161_v40 = vsub.f32 0.0, %v145_v21 }
   0x9   :  { %v151_v38 = vand.u32 2147483647, %v1098_v13  ;;  %v152_v39 = vand.u32 2147483647, %v1103_v14  ;;  %v153_v42 = vand.u32 2147483647, %v1110_v17 }
   0xa   :  { %v154_v43 = vand.u32 2147483647, %v1119_v22  ;;  %v162_v44 = vsub.f32 0.0, %v146_v26  ;;  %v163_v46 = vsub.f32 0.0, %v147_v27  ;;  %v173_v47 = vmul.f32 1.442695, %v157_v29 }
   0xb   :  { %v175_v48 = vmul.f32 1.442695, %v158_v30  ;;  %v164_v50 = vsub.f32 0.0, %v148_v28  ;;  %v177_v51 = vmul.f32 1.442695, %v159_v34  ;;  %v165_v54 = vsub.f32 0.0, %v149_v32 }
   0xc   :  { %v179_v52 = vmul.f32 1.442695, %v160_v35  ;;  %v155_v53 = vand.u32 2147483647, %v1130_v31  ;;  %860 = vpow2.f32 %v173_v47  ;;  %v181_v55 = vmul.f32 1.442695, %v161_v40 }
   0xd   :  { %v156_v56 = vand.u32 2147483647, %v1137_v36  ;;  %v166_v57 = vsub.f32 0.0, %v150_v33  ;;  %862 = vpow2.f32 %v175_v48  ;;  %v183_v58 = vmul.f32 1.442695, %v162_v44  ;;  %s784_s18 = sshll.u32 %s1929_s9, 4  ;;  %s785_s18 = int_to_ptr.hbm [resolvable:$true] %s784_s18 }
   0xe   :  { %v167_v60 = vsub.f32 0.0, %v151_v38  ;;  %864 = vpow2.f32 %v177_v51  ;;  %v185_v61 = vmul.f32 1.442695, %v163_v46  ;;  %v168_v63 = vsub.f32 0.0, %v152_v39  ;;  %s990_s21 = smov [#allocation4]   ;;  %s991_s22 = smov [#allocation6]  }
   0xf   :  { %866 = vpow2.f32 %v179_v52  ;;  %v187_v11 = vmul.f32 1.442695, %v164_v50  ;;  %v169_v12 = vsub.f32 0.0, %v153_v42  ;;  %v170_v15 = vsub.f32 0.0, %v154_v43 }
  0x10   :  { %868 = vpow2.f32 %v181_v55  ;;  %v189_v16 = vmul.f32 1.442695, %v165_v54  ;;  %v171_v21 = vsub.f32 0.0, %v155_v53  ;;  %v172_v26 = vsub.f32 0.0, %v156_v56 }
  0x11   :  { %870 = vpow2.f32 %v183_v58  ;;  %v191_v27 = vmul.f32 1.442695, %v166_v57  ;;  %v193_v32 = vmul.f32 1.442695, %v167_v60  ;;  %v195_v35 = vmul.f32 1.442695, %v168_v63 }
  0x12   :  { %v861_v28 = vpop.eup %860  ;;  %872 = vpow2.f32 %v185_v61  ;;  %v197_v40 = vmul.f32 1.442695, %v169_v12  ;;  %v199_v42 = vmul.f32 1.442695, %v170_v15  ;;  %v201_v46 = vmul.f32 1.442695, %v171_v21 }
  0x13   :  { %v863_v33 = vpop.eup %862  ;;  %874 = vpow2.f32 %v187_v11  ;;  %v208_v38 = vmul.f32 -0.5, %v861_v28  ;;  %v203_v47 = vmul.f32 1.442695, %v172_v26  ;;  %v205_v51 = vadd.f32 1.0, %v861_v28 }
  0x14   :  { %v865_v39 = vpop.eup %864  ;;  %876 = vpow2.f32 %v189_v16  ;;  %v217_v43 = vmul.f32 -0.5, %v863_v33  ;;  %v211_v52 = vand.u32 2147483647, %v861_v28  ;;  %v214_v55 = vadd.f32 1.0, %v863_v33 }
  0x15   :  { %v867_v44 = vpop.eup %866  ;;  %878 = vpow2.f32 %v191_v27  ;;  %v209_v48 = vadd.f32 1.0, %v208_v38  ;;  %v226_v53 = vmul.f32 -0.5, %v865_v39  ;;  %v220_v57 = vand.u32 2147483647, %v863_v33 }
  0x16   :  { %v869_v50 = vpop.eup %868  ;;  %880 = vpow2.f32 %v193_v32  ;;  %v218_v56 = vadd.f32 1.0, %v217_v43  ;;  %v223_v60 = vadd.f32 1.0, %v865_v39  ;;  %v235_v63 = vmul.f32 -0.5, %v867_v44 }
  0x17   :  { %v871_v54 = vpop.eup %870  ;;  %882 = vpow2.f32 %v195_v35  ;;  %v227_v61 = vadd.f32 1.0, %v226_v53  ;;  %v1158_v12 = vmul.f32 %v861_v28, %v209_v48  ;;  %v229_v15 = vand.u32 2147483647, %v865_v39 }
  0x18   :  { %v1154_v58 = vpop.eup %872  ;;  %884 = vpow2.f32 %v197_v40  ;;  %v232_v16 = vadd.f32 1.0, %v867_v44  ;;  %v236_v26 = vadd.f32 1.0, %v235_v63  ;;  %v238_v27 = vand.u32 2147483647, %v867_v44 }
  0x19   :  { %v1156_v11 = vpop.eup %874  ;;  %886 = vpow2.f32 %v199_v42  ;;  %v244_v32 = vmul.f32 -0.5, %v869_v50  ;;  %vm1164_vm0 = vcmp.lt.f32.partialorder %v211_v52, 0.0004427343  ;;  %v1168_v40 = vmul.f32 %v863_v33, %v218_v56 }
  0x1a   :  { %v1160_v21 = vpop.eup %876  ;;  %888 = vpow2.f32 %v201_v46  ;;  %v241_v42 = vadd.f32 1.0, %v869_v50  ;;  %v247_v28 = vand.u32 2147483647, %v869_v50  ;;  %vm1172_vm1 = vcmp.lt.f32.partialorder %v220_v57, 0.0004427343 }
  0x1b   :  { %v1162_v35 = vpop.eup %878  ;;  %890 = vpow2.f32 %v203_v47  ;;  %v1176_v46 = vmul.f32 %v865_v39, %v227_v61  ;;  %v245_v53 = vadd.f32 1.0, %v244_v32  ;;  %v253_v63 = vmul.f32 -0.5, %v871_v54 }
  0x1c   :  { %v1170_v43 = vpop.eup %880  ;;  %892 = vlog2.f32 %v205_v51  ;;  %v1180_v52 = vmul.f32 %v867_v44, %v236_v26  ;;  %v250_v33 = vadd.f32 1.0, %v871_v54  ;;  %v256_v56 = vand.u32 2147483647, %v871_v54 }
  0x1d   :  { %v1178_v47 = vpop.eup %882  ;;  %894 = vlog2.f32 %v214_v55  ;;  %vm1184_vm2 = vcmp.lt.f32.partialorder %v229_v15, 0.0004427343  ;;  %vm1188_vm3 = vcmp.lt.f32.partialorder %v238_v27, 0.0004427343  ;;  %v254_v39 = vadd.f32 1.0, %v253_v63 }
  0x1e   :  { %v1182_v34 = vpop.eup %884  ;;  %896 = vlog2.f32 %v223_v60  ;;  %v259_v61 = vadd.f32 1.0, %v1154_v58  ;;  %v262_v55 = vmul.f32 -0.5, %v1154_v58  ;;  %vm1196_vm4 = vcmp.lt.f32.partialorder %v247_v28, 0.0004427343 }
  0x1f   :  { %v1194_v44 = vpop.eup %886  ;;  %898 = vlog2.f32 %v232_v16  ;;  %v265_v60 = vand.u32 2147483647, %v1154_v58  ;;  %v268_v15 = vadd.f32 1.0, %v1156_v11  ;;  %v1204_v32 = vmul.f32 %v869_v50, %v245_v53 }
  0x20   :  { %v1202_v27 = vpop.eup %888  ;;  %900 = vlog2.f32 %v241_v42  ;;  %v263_v63 = vadd.f32 1.0, %v262_v55  ;;  %v271_v30 = vmul.f32 -0.5, %v1156_v11  ;;  %vm1209_vm5 = vcmp.lt.f32.partialorder %v256_v56, 0.0004427343 }
  0x21   :  { %v1207_v29 = vpop.eup %890  ;;  %902 = vlog2.f32 %v250_v33  ;;  %v274_v28 = vand.u32 2147483647, %v1156_v11  ;;  %v277_v62 = vadd.f32 1.0, %v1160_v21  ;;  %v1215_v49 = vmul.f32 %v871_v54, %v254_v39 }
  0x22   :  { %v893_v59 = vpop.eup %892  ;;  %904 = vlog2.f32 %v259_v61  ;;  %v272_v50 = vadd.f32 1.0, %v271_v30  ;;  %v280_v42 = vmul.f32 -0.5, %v1160_v21  ;;  %vm1220_vm6 = vcmp.lt.f32.partialorder %v265_v60, 0.0004427343 }
  0x23   :  { %v895_v53 = vpop.eup %894  ;;  %v1218_v55 = vmul.f32 0.6931472, %v893_v59  ;;  %906 = vlog2.f32 %v268_v15  ;;  %v283_v56 = vand.u32 2147483647, %v1160_v21  ;;  %v1228_v54 = vmul.f32 %v1154_v58, %v263_v63 }
  0x24   :  { %v897_v45 = vpop.eup %896  ;;  %v1225_v41 = vmul.f32 0.6931472, %v895_v53  ;;  %908 = vlog2.f32 %v277_v62  ;;  %v281_v30 = vadd.f32 1.0, %v280_v42  ;;  %v1233_v59 = vmul.f32 %v1156_v11, %v272_v50 }
  0x25   :  { %v899_v39 = vpop.eup %898  ;;  %v1230_v61 = vmul.f32 0.6931472, %v897_v45  ;;  %vm1235_vm7 = vcmp.lt.f32.partialorder %v274_v28, 0.0004427343  ;;  %v1966_v60 = vmov 0  ;;  %v286_v15 = vadd.f32 1.0, %v1162_v35 }
  0x26   :  { %1965 = vst [vmem:[#allocation10_spill] sm:$0xff] %v1233_v59  ;;  %v1967_v60 = vsel %vm1235_vm7, 4294967295, %v1966_v60  ;;  %v901_v37 = vpop.eup %900  ;;  %v1244_v62 = vmul.f32 0.6931472, %v899_v39  ;;  %vm1246_vm8 = vcmp.lt.f32.partialorder %v283_v56, 0.0004427343  ;;  %v1261_v56 = vmul.f32 %v1160_v21, %v281_v30 }
  0x27   :  { %v1968_v45 = vmov 0  ;;  %v289_v11 = vmul.f32 -0.5, %v1162_v35  ;;  %v903_v63 = vpop.eup %902  ;;  %v1255_v50 = vmul.f32 0.6931472, %v901_v37  ;;  %910 = vlog2.f32 %v286_v15 }
  0x28   :  { %v1969_v45 = vsel %vm1246_vm8, 4294967295, %v1968_v45  ;;  %v292_v42 = vand.u32 2147483647, %v1162_v35  ;;  %v905_v53 = vpop.eup %904  ;;  %v1258_v39 = vmul.f32 0.6931472, %v903_v63  ;;  %v295_v24 = vadd.f32 1.0, %v1170_v43 }
  0x29   :  { %v290_v25 = vadd.f32 1.0, %v289_v11  ;;  %v907_v23 = vpop.eup %906  ;;  %v1272_v15 = vmul.f32 0.6931472, %v905_v53  ;;  %v298_v63 = vmul.f32 -0.5, %v1170_v43  ;;  %v301_v28 = vand.u32 2147483647, %v1170_v43 }
  0x2a   :  { %v909_v21 = vpop.eup %908  ;;  %v1279_v11 = vmul.f32 0.6931472, %v907_v23  ;;  %vm1281_vm9 = vcmp.lt.f32.partialorder %v292_v42, 0.0004427343  ;;  %912 = vlog2.f32 %v295_v24  ;;  %v304_v23 = vadd.f32 1.0, %v1178_v47 }
  0x2b   :  { %v1972_v19 = vsel %vm1281_vm9, 4294967295, %v1971_v19  ;;  %v1289_v37 = vmul.f32 0.6931472, %v909_v21  ;;  %v1292_v20 = vmul.f32 %v1162_v35, %v290_v25  ;;  %v299_v30 = vadd.f32 1.0, %v298_v63 }
  0x2c   :  { %1970 = vst [vmem:[#allocation11_spill] sm:$0xff] %v1279_v11  ;;  %v307_v42 = vmul.f32 -0.5, %v1178_v47  ;;  %v310_v18 = vand.u32 2147483647, %v1178_v47  ;;  %v313_v63 = vadd.f32 1.0, %v1182_v34  ;;  %914 = vlog2.f32 %v304_v23 }
  0x2d   :  { %1973 = vst [vmem:[#allocation12_spill] sm:$0xff] %v1972_v19  ;;  %v911_v24 = vpop.eup %910  ;;  %vm1313_vm10 = vcmp.lt.f32.partialorder %v301_v28, 0.0004427343  ;;  %v316_v8 = vmul.f32 -0.5, %v1182_v34  ;;  %v319_v25 = vand.u32 2147483647, %v1182_v34  ;;  %v1321_v35 = vmul.f32 %v1170_v43, %v299_v30 }
  0x2e   :  { %1974 = vst [vmem:[#allocation13_spill] sm:$0xff] %v1292_v20  ;;  %v1311_v21 = vmul.f32 0.6931472, %v911_v24  ;;  %v308_v53 = vadd.f32 1.0, %v307_v42  ;;  %916 = vlog2.f32 %v313_v63  ;;  %v322_v11 = vadd.f32 1.0, %v1194_v44 }
  0x2f   :  { %vm1323_vm11 = vcmp.lt.f32.partialorder %v310_v18, 0.0004427343  ;;  %v325_v28 = vmul.f32 -0.5, %v1194_v44  ;;  %v328_v23 = vand.u32 2147483647, %v1194_v44  ;;  %v317_v43 = vadd.f32 1.0, %v316_v8 }
  0x30   :  { %1975 = vst [vmem:[#allocation14_spill] sm:$0xff] %v1311_v21  ;;  %v913_v59 = vpop.eup %912  ;;  %918 = vlog2.f32 %v322_v11  ;;  %vm1343_vm8 = vcmp.lt.f32.partialorder %v319_v25, 0.0004427343  ;;  %v331_v42 = vadd.f32 1.0, %v1202_v27  ;;  %v1354_v8 = vmul.f32 %v1178_v47, %v308_v53 }
  0x31   :  { %v1335_v63 = vmul.f32 0.6931472, %v913_v59  ;;  %v326_v30 = vadd.f32 1.0, %v325_v28  ;;  %v334_v59 = vmul.f32 -0.5, %v1202_v27  ;;  %vm1356_vm14 = vcmp.lt.f32.partialorder %v328_v23, 0.0004427343 }
  0x32   :  { %v337_v25 = vand.u32 2147483647, %v1202_v27  ;;  %v340_v28 = vadd.f32 1.0, %v1207_v29  ;;  %v915_v21 = vpop.eup %914  ;;  %v318_v47 = vmul.f32 %v1182_v34, %v317_v43  ;;  %920 = vlog2.f32 %v331_v42 }
  0x33   :  { %v335_v53 = vadd.f32 1.0, %v334_v59  ;;  %v343_v23 = vmul.f32 -0.5, %v1207_v29  ;;  %v303_v34 = vsel %vm1313_vm10, %v1321_v35, %v1335_v63  ;;  %v306_v42 = vmul.f32 0.6931472, %v915_v21 }
  0x34   :  { %v917_v20 = vpop.eup %916  ;;  %922 = vlog2.f32 %v340_v28  ;;  %v346_v43 = vand.u32 2147483647, %v1207_v29  ;;  %v327_v19 = vmul.f32 %v1194_v44, %v326_v30  ;;  %vm1391_vm13 = vcmp.lt.f32.partialorder %v337_v25, 0.0004427343 }
  0x35   :  { %v315_v59 = vmul.f32 0.6931472, %v917_v20  ;;  %v344_v35 = vadd.f32 1.0, %v343_v23  ;;  %vm78_vm10 = vcmp.gt.f32.partialorder %v1050_v1, 20.0  ;;  %v312_v20 = vsel %vm1323_vm11, %v1354_v8, %v306_v42 }
  0x36   :  { %v919_v21 = vpop.eup %918  ;;  %v336_v44 = vmul.f32 %v1202_v27, %v335_v53  ;;  %vm1403_vm12 = vcmp.lt.f32.partialorder %v346_v43, 0.0004427343  ;;  %v1988_v30 = vmax.f32 %v1045_v0, 0.0  ;;  %v1989_v25 = vsel %vm1164_vm0, %v1158_v12, %v1218_v55 }
  0x37   :  { %vm82_vm15 = vcmp.gt.f32.partialorder %v1070_v5, 20.0  ;;  %vm83_vm7 = vcmp.gt.f32.partialorder %v1075_v6, 20.0  ;;  %v321_v27 = vsel %vm1343_vm8, %v318_v47, %v315_v59  ;;  %v324_v24 = vmul.f32 0.6931472, %v919_v21  ;;  %v2014_v21 = vld [vmem:[#allocation14_spill] sm:$0xff] }
  0x38   :  { %v349_v28 = vadd.f32 %v1989_v25, %v1988_v30  ;;  %v1990_v8 = vmax.f32 %v1050_v1, 0.0  ;;  %v1991_v12 = vsel %vm1172_vm1, %v1168_v40, %v1225_v41  ;;  %v1992_v55 = vmax.f32 %v1055_v2, 0.0  ;;  %v921_v42 = vpop.eup %920 }
  0x39   :  { %v1993_v53 = vsel %vm1184_vm2, %v1176_v46, %v1230_v61  ;;  %vm86_vm0 = vcmp.gt.f32.partialorder %v1091_v10, 20.0  ;;  %vm87_vm8 = vcmp.gt.f32.partialorder %v1098_v13, 20.0  ;;  %vm88_vm9 = vcmp.gt.f32.partialorder %v1103_v14, 20.0 }
  0x3a   :  { %v350_v38 = vadd.f32 %v1991_v12, %v1990_v8  ;;  %v351_v23 = vadd.f32 %v1993_v53, %v1992_v55  ;;  %vm89_vm11 = vcmp.gt.f32.partialorder %v1110_v17, 20.0  ;;  %v345_v48 = vmul.f32 %v1207_v29, %v344_v35  ;;  %v923_v11 = vpop.eup %922  ;;  %v2011_v35 = vld [vmem:[#allocation12_spill] sm:$0xff] }
  0x3b   :  { %v1994_v41 = vmax.f32 %v1060_v3, 0.0  ;;  %v1995_v40 = vsel %vm1188_vm3, %v1180_v52, %v1244_v62  ;;  %v1996_v46 = vmax.f32 %v1065_v4, 0.0  ;;  %v1997_v61 = vsel %vm1196_vm4, %v1204_v32, %v1255_v50  ;;  %v2005_v50 = vld [vmem:[#allocation11_spill] sm:$0xff] }
  0x3c   :  { %v1998_v47 = vmax.f32 %v1070_v5, 0.0  ;;  %v1999_v29 = vsel %vm1209_vm5, %v1215_v49, %v1258_v39  ;;  %vm90_vm1 = vcmp.gt.f32.partialorder %v1119_v22, 20.0  ;;  %v330_v52 = vsel %vm1356_vm14, %v327_v19, %v324_v24  ;;  %v2004_v49 = vld [vmem:[#allocation10_spill] sm:$0xff] }
  0x3d   :  { %v352_v51 = vadd.f32 %v1995_v40, %v1994_v41  ;;  %v353_v18 = vadd.f32 %v1997_v61, %v1996_v46  ;;  %v2000_v26 = vmax.f32 %v1075_v6, 0.0  ;;  %v2001_v32 = vsel %vm1220_vm6, %v1228_v54, %v1272_v15 }
  0x3e   :  { %v354_v57 = vadd.f32 %v1999_v29, %v1998_v47  ;;  %v2002_v16 = vmax.f32 %v1080_v7, 0.0  ;;  %vm2003_vm2 = vnez %v1967_v60  ;;  %v2007_v59 = vmax.f32 %v1086_v9, 0.0  ;;  %v2013_v60 = vld [vmem:[#allocation13_spill] sm:$0xff] }
  0x3f   :  { %v355_v62 = vadd.f32 %v2001_v32, %v2000_v26  ;;  %v2006_v39 = vsel %vm2003_vm2, %v2004_v49, %v2005_v50  ;;  %vm2008_vm3 = vnez %v1969_v45  ;;  %vm91_vm4 = vcmp.gt.f32.partialorder %v1130_v31, 20.0 }
  0x40   :  { %v356_v43 = vadd.f32 %v2006_v39, %v2002_v16  ;;  %v2009_v19 = vsel %vm2008_vm3, %v1261_v56, %v1289_v37  ;;  %v333_v54 = vmul.f32 0.6931472, %v921_v42  ;;  %v2010_v15 = vmax.f32 %v1091_v10, 0.0 }
  0x41   :  { %v357_v33 = vadd.f32 %v2009_v19, %v2007_v59  ;;  %vm2012_vm5 = vnez %v2011_v35  ;;  %v2016_v24 = vmax.f32 %v1098_v13, 0.0  ;;  %v2017_v45 = vmax.f32 %v1103_v14, 0.0  ;;  %v1639_v19 = vld [vmem:[%s1922_s2 + $0x18] sm:$0xff] }
  0x42   :  { %v2015_v30 = vsel %vm2012_vm5, %v2013_v60, %v2014_v21  ;;  %vm92_vm6 = vcmp.gt.f32.partialorder %v1137_v36, 20.0  ;;  %v342_v56 = vmul.f32 0.6931472, %v923_v11  ;;  %v2018_v37 = vmax.f32 %v1110_v17, 0.0  ;;  %v1654_v11 = vld [vmem:[%s1922_s2 + $0x30] sm:$0xff]  ;;  %v1668_v21 = vld [vmem:[%s1922_s2 + $0x38] sm:$0xff] }
  0x43   :  { %v358_v25 = vadd.f32 %v2015_v30, %v2010_v15  ;;  %v359_v8 = vadd.f32 %v303_v34, %v2016_v24  ;;  %v360_v12 = vadd.f32 %v312_v20, %v2017_v45  ;;  %v2019_v53 = vmax.f32 %v1119_v22, 0.0  ;;  %2044 = vst [vmem:[#allocation10_spill] sm:$0xff] %v1668_v21  ;;  %v1673_v30 = vld [vmem:[%s1922_s2 + $0x40] sm:$0xff] }
  0x44   :  { %v361_v55 = vadd.f32 %v321_v27, %v2018_v37  ;;  %vm2020_vm14 = vcmp.ne.f32.partialorder %v1045_v0, %v1045_v0  ;;  %v339_v34 = vsel %vm1391_vm13, %v336_v44, %v333_v54  ;;  %vm2021_vm2 = vcmp.ne.f32.partialorder %v1050_v1, %v1050_v1  ;;  %2045 = vst [vmem:[#allocation11_spill] sm:$0xff] %v1673_v30 }
  0x45   :  { %v362_v41 = vadd.f32 %v330_v52, %v2019_v53  ;;  %v365_v40 = vsel %vm2020_vm14, %v1045_v0, %v349_v28  ;;  %v366_v20 = vsel %vm2021_vm2, %v1050_v1, %v350_v38  ;;  %vm2022_vm3 = vcmp.ne.f32.partialorder %v1055_v2, %v1055_v2 }
  0x46   :  { %v367_v27 = vsel %vm2022_vm3, %v1055_v2, %v351_v23  ;;  %vm2023_vm5 = vcmp.ne.f32.partialorder %v1060_v3, %v1060_v3  ;;  %v348_v28 = vsel %vm1403_vm12, %v345_v48, %v342_v56  ;;  %v2024_v58 = vmax.f32 %v1130_v31, 0.0  ;;  %v1697_v56 = vld [vmem:[%s1922_s2 + $0x58] sm:$0xff] }
  0x47   :  { %v368_v46 = vsel %vm2023_vm5, %v1060_v3, %v352_v51  ;;  %vm2025_vm13 = vcmp.ne.f32.partialorder %v1065_v4, %v1065_v4  ;;  %vm2026_vm14 = vcmp.ne.f32.partialorder %v1070_v5, %v1070_v5  ;;  %v2027_v61 = vmax.f32 %v1137_v36, 0.0  ;;  %2048 = vst [vmem:[#allocation14_spill] sm:$0xff] %v1697_v56 }
  0x48   :  { %v363_v44 = vadd.f32 %v339_v34, %v2024_v58  ;;  %v369_v38 = vsel %vm2025_vm13, %v1065_v4, %v353_v18  ;;  %v370_v23 = vsel %vm2026_vm14, %v1070_v5, %v354_v57  ;;  %vm2028_vm12 = vcmp.ne.f32.partialorder %v1075_v6, %v1075_v6  ;;  %v1733_v58 = vld [vmem:[%s1922_s2 + $0x70] sm:$0xff] }
  0x49   :  { %v364_v47 = vadd.f32 %v348_v28, %v2027_v61  ;;  %v371_v63 = vsel %vm2028_vm12, %v1075_v6, %v355_v62  ;;  %vm2029_vm2 = vcmp.ne.f32.partialorder %v1080_v7, %v1080_v7  ;;  %vm2030_vm3 = vcmp.ne.f32.partialorder %v1086_v9, %v1086_v9  ;;  %v1728_v28 = vld [vmem:[%s1922_s2 + $0x68] sm:$0xff]  ;;  %2054 = vst [vmem:[#allocation20_spill] sm:$0xff] %v1733_v58 }
  0x4a   :  { %v372_v48 = vsel %vm2029_vm2, %v1080_v7, %v356_v43  ;;  %v373_v51 = vsel %vm2030_vm3, %v1086_v9, %v357_v33  ;;  %vm2031_vm5 = vcmp.ne.f32.partialorder %v1091_v10, %v1091_v10  ;;  %vm2032_vm13 = vcmp.ne.f32.partialorder %v1098_v13, %v1098_v13  ;;  %v1644_v33 = vld [vmem:[%s1922_s2 + $0x20] sm:$0xff]  ;;  %2053 = vst [vmem:[#allocation19_spill] sm:$0xff] %v1728_v28 }
  0x4b   :  { %v374_v18 = vsel %vm2031_vm5, %v1091_v10, %v358_v25  ;;  %v375_v29 = vsel %vm2032_vm13, %v1098_v13, %v359_v8  ;;  %vm2033_vm14 = vcmp.ne.f32.partialorder %v1103_v14, %v1103_v14  ;;  %vm2034_vm12 = vcmp.ne.f32.partialorder %v1110_v17, %v1110_v17  ;;  %v1683_v25 = vld [vmem:[%s1922_s2 + $0x50] sm:$0xff] }
  0x4c   :  { %v376_v57 = vsel %vm2033_vm14, %v1103_v14, %v360_v12  ;;  %v377_v42 = vsel %vm2034_vm12, %v1110_v17, %v361_v55  ;;  %vm2035_vm2 = vcmp.ne.f32.partialorder %v1119_v22, %v1119_v22  ;;  %vm2036_vm3 = vcmp.ne.f32.partialorder %v1130_v31, %v1130_v31  ;;  %2047 = vst [vmem:[#allocation13_spill] sm:$0xff] %v1683_v25 }
  0x4d   :  { %v378_v52 = vsel %vm2035_vm2, %v1119_v22, %v362_v41  ;;  %v379_v26 = vsel %vm2036_vm3, %v1130_v31, %v363_v44  ;;  %vm2037_vm5 = vcmp.ne.f32.partialorder %v1137_v36, %v1137_v36  ;;  %vm2038_vm13 = vcmp.gt.f32.partialorder %v1045_v0, 20.0  ;;  %v30_v41 = vld [vmem:[%s1920_s0 + $0x8] sm:$0xff] }
  0x4e   :  { %v380_v32 = vsel %vm2037_vm5, %v1137_v36, %v364_v47  ;;  %v381_v62 = vsel %vm2038_vm13, %v1045_v0, %v365_v40  ;;  %v382_v16 = vsel %vm78_vm10, %v1050_v1, %v366_v20  ;;  %vm2039_vm14 = vcmp.gt.f32.partialorder %v1055_v2, 20.0  ;;  %v31_v40 = vld [vmem:[%s1920_s0 + $0x10] sm:$0xff]  ;;  %v32_v47 = vld [vmem:[%s1920_s0 + $0x18] sm:$0xff] }
  0x4f   :  { %v383_v49 = vsel %vm2039_vm14, %v1055_v2, %v367_v27  ;;  %vm2040_vm12 = vcmp.gt.f32.partialorder %v1060_v3, 20.0  ;;  %vm2041_vm2 = vcmp.gt.f32.partialorder %v1065_v4, 20.0  ;;  %v386_v0 = vsel %vm82_vm15, %v1070_v5, %v370_v23 }
  0x50   :  { %v384_v50 = vsel %vm2040_vm12, %v1060_v3, %v368_v46  ;;  %v385_v39 = vsel %vm2041_vm2, %v1065_v4, %v369_v38  ;;  %v387_v1 = vsel %vm83_vm7, %v1075_v6, %v371_v63  ;;  %vm2042_vm10 = vcmp.gt.f32.partialorder %v1080_v7, 20.0  ;;  %v1723_v46 = vld [vmem:[%s1922_s2 + $0x60] sm:$0xff] }
  0x51   :  { %v388_v2 = vsel %vm2042_vm10, %v1080_v7, %v372_v48  ;;  %vm2043_vm3 = vcmp.gt.f32.partialorder %v1086_v9, 20.0  ;;  %v390_v4 = vsel %vm86_vm0, %v1091_v10, %v374_v18  ;;  %v391_v5 = vsel %vm87_vm8, %v1098_v13, %v375_v29  ;;  %v1620_v10 = vld [vmem:[%s1922_s2 + $0x8] sm:$0xff]  ;;  %v1625_v13 = vld [vmem:[%s1922_s2 + $0x10] sm:$0xff]  ;;  %2052 = vst [vmem:[#allocation18_spill] sm:$0xff] %v1723_v46  ;;  %v33_v63 = vld [vmem:[%s1920_s0 + $0x20] sm:$0xff] }
  0x52   :  { %v389_v3 = vsel %vm2043_vm3, %v1086_v9, %v373_v51  ;;  %v392_v6 = vsel %vm88_vm9, %v1103_v14, %v376_v57  ;;  %v393_v7 = vsel %vm89_vm11, %v1110_v17, %v377_v42  ;;  %v1615_v9 = vld [vmem:[%s1922_s2] sm:$0xff]  ;;  %v394_v14 = vsel %vm90_vm1, %v1119_v22, %v378_v52  ;;  %v1649_v22 = vld [vmem:[%s1922_s2 + $0x28] sm:$0xff]  ;;  %v1752_v48 = vld [vmem:[%s1922_s2 + $0x78] sm:$0xff] }
  0x53   :  { %v1630_v17 = vadd.f32 1e-06, %v381_v62  ;;  %v1632_v43 = vadd.f32 1e-06, %v382_v16  ;;  %v1634_v59 = vadd.f32 1e-06, %v383_v49  ;;  %v395_v54 = vsel %vm91_vm4, %v1130_v31, %v379_v26 }
  0x54   :  { %v1659_v15 = vadd.f32 1e-06, %v384_v50  ;;  %v1661_v35 = vadd.f32 1e-06, %v385_v39  ;;  %v1663_v60 = vadd.f32 1e-06, %v386_v0  ;;  %v396_v24 = vsel %vm92_vm6, %v1137_v36, %v380_v32 }
  0x55   :  { %v1678_v31 = vld [vmem:[%s1922_s2 + $0x48] sm:$0xff]  ;;  %v1688_v8 = vadd.f32 1e-06, %v387_v1  ;;  %v1690_v45 = vadd.f32 1e-06, %v388_v2  ;;  %v29_v36 = vld [vmem:[%s1920_s0] sm:$0xff]  ;;  %v413_v38 = vmul.f32 %v1630_v17, %v1615_v9  ;;  %v414_v23 = vmul.f32 %v1632_v43, %v1620_v10 }
  0x56   :  { %2046 = vst [vmem:[#allocation12_spill] sm:$0xff] %v1678_v31  ;;  %v1692_v12 = vadd.f32 1e-06, %v389_v3  ;;  %v1699_v37 = vadd.f32 1e-06, %v390_v4  ;;  %v415_v61 = vmul.f32 %v1634_v59, %v1625_v13  ;;  %v416_v51 = vmul.f32 %v1659_v15, %v1639_v19  ;;  %v34_v42 = vld [vmem:[%s1920_s0 + $0x28] sm:$0xff] }
  0x57   :  { %v1701_v55 = vadd.f32 1e-06, %v391_v5  ;;  %v1703_v53 = vadd.f32 1e-06, %v392_v6  ;;  %v1714_v34 = vadd.f32 1e-06, %v393_v7  ;;  %v417_v18 = vmul.f32 %v1661_v35, %v1644_v33 }
  0x58   :  { %v1716_v20 = vadd.f32 1e-06, %v394_v14  ;;  %v1718_v27 = vadd.f32 1e-06, %v395_v54  ;;  %v1735_v44 = vadd.f32 1e-06, %v396_v24  ;;  %v418_v29 = vmul.f32 %v1663_v60, %v1649_v22 }
  0x59   :  { %2049 = vst [vmem:[#allocation15_spill] sm:$0xff] %v1714_v34  ;;  %v419_v57 = vmul.f32 %v1688_v8, %v1654_v11  ;;  %v35_v52 = vld [vmem:[%s1920_s0 + $0x30] sm:$0xff]  ;;  %v36_v26 = vld [vmem:[%s1920_s0 + $0x38] sm:$0xff]  ;;  %v420_v32 = vmul.f32 %v1690_v45, %v1668_v21  ;;  %v421_v62 = vmul.f32 %v1692_v12, %v1673_v30  ;;  %v422_v16 = vmul.f32 %v1699_v37, %v1678_v31  ;;  %v37_v50 = vld [vmem:[%s1920_s0 + $0x40] sm:$0xff] }
  0x5a   :  { %2050 = vst [vmem:[#allocation16_spill] sm:$0xff] %v1716_v20  ;;  %v423_v49 = vmul.f32 %v1701_v55, %v1683_v25  ;;  %v38_v39 = vld [vmem:[%s1920_s0 + $0x48] sm:$0xff]  ;;  %v39_v0 = vld [vmem:[%s1920_s0 + $0x50] sm:$0xff]  ;;  %v424_v1 = vmul.f32 %v1703_v53, %v1697_v56  ;;  %v425_v2 = vmul.f32 %v1714_v34, %v1723_v46  ;;  %v426_v3 = vmul.f32 %v1716_v20, %v1728_v28  ;;  %v40_v5 = vld [vmem:[%s1920_s0 + $0x58] sm:$0xff] }
  0x5b   :  { %2051 = vst [vmem:[#allocation17_spill] sm:$0xff] %v1718_v27  ;;  %v427_v4 = vmul.f32 %v1718_v27, %v1733_v58  ;;  %v41_v6 = vld [vmem:[%s1920_s0 + $0x60] sm:$0xff]  ;;  %v428_v7 = vmul.f32 %v1735_v44, %v1752_v48  ;;  %v1804_v14 = vadd.f32 %v413_v38, %v29_v36  ;;  %v430_v54 = vadd.f32 %v414_v23, %v30_v41  ;;  %v42_v28 = vld [vmem:[%s1920_s0 + $0x68] sm:$0xff]  ;;  %v43_v58 = vld [vmem:[%s1920_s0 + $0x70] sm:$0xff] }
  0x5c   :  { %2055 = vst [vmem:[#allocation21_spill] sm:$0xff] %v1735_v44  ;;  %v431_v24 = vadd.f32 %v415_v61, %v31_v40  ;;  %v432_v46 = vadd.f32 %v416_v51, %v32_v47  ;;  %v433_v56 = vadd.f32 %v417_v18, %v33_v63  ;;  %v434_v25 = vadd.f32 %v418_v29, %v34_v42 }
  0x5d   :  { %2056 = vst [vmem:[#allocation22_spill] sm:$0xff] %v1752_v48  ;;  %v435_v31 = vadd.f32 %v419_v57, %v35_v52  ;;  %v44_v48 = vld [vmem:[%s1920_s0 + $0x78] sm:$0xff]  ;;  %v436_v36 = vadd.f32 %v420_v32, %v36_v26  ;;  %v437_v38 = vadd.f32 %v421_v62, %v37_v50  ;;  %v438_v41 = vadd.f32 %v422_v16, %v38_v39 }
  0x5e   :  { %v439_v40 = vadd.f32 %v423_v49, %v39_v0  ;;  %v440_v23 = vadd.f32 %v424_v1, %v40_v5  ;;  %v441_v61 = vadd.f32 %v425_v2, %v41_v6  ;;  %v811_v44 = vpack.c.bf16 %v432_v46, %v431_v24 }
  0x5f   :  { %v816_v27 = vpack.c.bf16 %v434_v25, %v433_v56  ;;  %v442_v30 = vadd.f32 %v426_v3, %v42_v28  ;;  %v443_v20 = vadd.f32 %v427_v4, %v43_v58  ;;  %v821_v21 = vpack.c.bf16 %v436_v36, %v435_v31 }
  0x60   :  { %v826_v34 = vpack.c.bf16 %v438_v41, %v437_v38  ;;  %v1815_v47 = vadd.f32 %v428_v7, %v44_v48  ;;  %843 = vst [vmem:[%s1926_s6 + $0x8] sm:$0xff] %v811_v44   ;;  %v831_v63 = vpack.c.bf16 %v440_v23, %v439_v40  ;;  %v573_v51 = vmul.f32 10.0, %v1804_v14 }
  0x61   :  { %v574_v18 = vmul.f32 10.0, %v430_v54  ;;  %844 = vst [vmem:[%s1926_s6 + $0x10] sm:$0xff] %v816_v27   ;;  %v836_v29 = vpack.c.bf16 %v442_v30, %v441_v61  ;;  %v575_v57 = vmul.f32 10.0, %v431_v24  ;;  %v576_v58 = vmul.f32 10.0, %v432_v46 }
  0x62   :  { %845 = vst [vmem:[%s1926_s6 + $0x18] sm:$0xff] %v821_v21   ;;  %v841_v28 = vpack.c.bf16 %v1815_v47, %v443_v20  ;;  %v577_v44 = vmul.f32 10.0, %v433_v56  ;;  %v589_v48 = vmul.f32 %v573_v51, %v573_v51  ;;  %v578_v21 = vmul.f32 10.0, %v434_v25 }
  0x63   :  { %846 = vst [vmem:[%s1926_s6 + $0x20] sm:$0xff] %v826_v34   ;;  %v590_v27 = vmul.f32 %v574_v18, %v574_v18  ;;  %v591_v42 = vmul.f32 %v575_v57, %v575_v57  ;;  %v592_v46 = vmul.f32 %v576_v58, %v576_v58  ;;  %v579_v52 = vmul.f32 10.0, %v435_v31 }
  0x64   :  { %847 = vst [vmem:[%s1926_s6 + $0x28] sm:$0xff] %v831_v63   ;;  %v593_v34 = vmul.f32 %v577_v44, %v577_v44  ;;  %v605_v26 = vmul.f32 0.5, %v589_v48  ;;  %v580_v16 = vmul.f32 10.0, %v436_v36  ;;  %v594_v56 = vmul.f32 %v578_v21, %v578_v21 }
  0x65   :  { %848 = vst [vmem:[%s1926_s6 + $0x30] sm:$0xff] %v836_v29   ;;  %v606_v32 = vmul.f32 0.5, %v590_v27  ;;  %v607_v62 = vmul.f32 0.5, %v591_v42  ;;  %v608_v49 = vmul.f32 0.5, %v592_v46  ;;  %v581_v50 = vmul.f32 10.0, %v437_v38 }
  0x66   :  { %849 = vst [vmem:[%s1926_s6 + $0x38] sm:$0xff] %v841_v28   ;;  %v595_v39 = vmul.f32 %v579_v52, %v579_v52  ;;  %v609_v0 = vmul.f32 0.5, %v593_v34  ;;  %v621_v1 = vsub.f32 1.3836466, %v605_v26  ;;  %v806_v3 = vpack.c.bf16 %v430_v54, %v1804_v14 }
  0x67   :  { %v622_v2 = vsub.f32 1.3836466, %v606_v32  ;;  %v582_v4 = vmul.f32 10.0, %v438_v41  ;;  %v623_v5 = vsub.f32 1.3836466, %v607_v62  ;;  %v596_v6 = vmul.f32 %v580_v16, %v580_v16 }
  0x68   :  { %v610_v25 = vmul.f32 0.5, %v594_v56  ;;  %v624_v7 = vsub.f32 1.3836466, %v608_v49  ;;  %807 = vst [vmem:[%s1926_s6] sm:$0xff] %v806_v3   ;;  %v583_v24 = vmul.f32 10.0, %v439_v40  ;;  %v597_v36 = vmul.f32 %v581_v50, %v581_v50 }
  0x69   :  { %v662_v31 = vadd.f32 %v622_v2, %v621_v1  ;;  %v611_v63 = vmul.f32 0.5, %v595_v39  ;;  %v625_v38 = vsub.f32 1.3836466, %v609_v0  ;;  %v584_v18 = vmul.f32 10.0, %v440_v23 }
  0x6a   :  { %v598_v29 = vmul.f32 %v582_v4, %v582_v4  ;;  %v612_v57 = vmul.f32 0.5, %v596_v6  ;;  %v626_v28 = vsub.f32 1.3836466, %v610_v25  ;;  %v585_v54 = vmul.f32 10.0, %v441_v61 }
  0x6b   :  { %v663_v51 = vadd.f32 %v662_v31, %v623_v5  ;;  %v599_v41 = vmul.f32 %v583_v24, %v583_v24  ;;  %v613_v58 = vmul.f32 0.5, %v597_v36  ;;  %v627_v44 = vsub.f32 1.3836466, %v611_v63 }
  0x6c   :  { %v586_v27 = vmul.f32 10.0, %v442_v30  ;;  %v587_v42 = vmul.f32 10.0, %v443_v20  ;;  %v600_v21 = vmul.f32 %v584_v18, %v584_v18  ;;  %v614_v46 = vmul.f32 0.5, %v598_v29 }
  0x6d   :  { %v664_v14 = vadd.f32 %v663_v51, %v624_v7  ;;  %v628_v52 = vsub.f32 1.3836466, %v612_v57  ;;  %924 = vlog2.f32 %v1630_v17  ;;  %v601_v34 = vmul.f32 %v585_v54, %v585_v54 }
  0x6e   :  { %926 = vlog2.f32 %v1632_v43  ;;  %v615_v23 = vmul.f32 0.5, %v599_v41  ;;  %v629_v26 = vsub.f32 1.3836466, %v613_v58  ;;  %v588_v61 = vmul.f32 10.0, %v1815_v47 }
  0x6f   :  { %v665_v48 = vadd.f32 %v664_v14, %v625_v38  ;;  %v602_v62 = vmul.f32 %v586_v27, %v586_v27  ;;  %v603_v16 = vmul.f32 %v587_v42, %v587_v42  ;;  %928 = vlog2.f32 %v1634_v59 }
  0x70   :  { %v616_v30 = vmul.f32 0.5, %v600_v21  ;;  %v630_v20 = vsub.f32 1.3836466, %v614_v46  ;;  %930 = vlog2.f32 %v1659_v15  ;;  %v617_v49 = vmul.f32 0.5, %v601_v34 }
  0x71   :  { %v666_v40 = vadd.f32 %v665_v48, %v626_v28  ;;  %v631_v17 = vsub.f32 1.3836466, %v615_v23  ;;  %v604_v43 = vmul.f32 %v588_v61, %v588_v61  ;;  %v618_v1 = vmul.f32 0.5, %v602_v62 }
  0x72   :  { %v619_v2 = vmul.f32 0.5, %v603_v16  ;;  %932 = vlog2.f32 %v1661_v35  ;;  %v632_v47 = vsub.f32 1.3836466, %v616_v30  ;;  %v633_v4 = vsub.f32 1.3836466, %v617_v49  ;;  %v2057_v16 = vld [vmem:[#allocation15_spill] sm:$0xff] }
  0x73   :  { %v667_v32 = vadd.f32 %v666_v40, %v627_v44  ;;  %v925_v50 = vpop.eup %924  ;;  %934 = vlog2.f32 %v1663_v60  ;;  %v525_v15 = vmul.f32 %v1615_v9, %v1615_v9  ;;  %v526_v31 = vmul.f32 %v1620_v10, %v1620_v10  ;;  %v2058_v30 = vld [vmem:[#allocation10_spill] sm:$0xff] }
  0x74   :  { %v927_v0 = vpop.eup %926  ;;  %v478_v5 = vmul.f32 0.6931472, %v925_v50  ;;  %936 = vlog2.f32 %v1688_v8  ;;  %v620_v24 = vmul.f32 0.5, %v604_v43  ;;  %v634_v35 = vsub.f32 1.3836466, %v618_v1 }
  0x75   :  { %v668_v56 = vadd.f32 %v667_v32, %v628_v52  ;;  %v929_v59 = vpop.eup %928  ;;  %v480_v7 = vmul.f32 0.6931472, %v927_v0  ;;  %v635_v36 = vsub.f32 1.3836466, %v619_v2  ;;  %938 = vlog2.f32 %v1690_v45  ;;  %v2060_v0 = vld [vmem:[#allocation11_spill] sm:$0xff] }
  0x76   :  { %v931_v6 = vpop.eup %930  ;;  %v482_v38 = vmul.f32 0.6931472, %v929_v59  ;;  %v527_v60 = vmul.f32 %v1625_v13, %v1625_v13  ;;  %940 = vlog2.f32 %v1692_v12  ;;  %v509_v18 = vsub.f32 -0.9189385, %v478_v5 }
  0x77   :  { %v669_v39 = vadd.f32 %v668_v56, %v629_v26  ;;  %v484_v9 = vmul.f32 0.6931472, %v931_v6  ;;  %v528_v8 = vmul.f32 %v1639_v19, %v1639_v19  ;;  %v510_v57 = vsub.f32 -0.9189385, %v480_v7  ;;  %v2062_v6 = vld [vmem:[#allocation12_spill] sm:$0xff] }
  0x78   :  { %v933_v51 = vpop.eup %932  ;;  %v541_v28 = vmul.f32 0.5, %v525_v15  ;;  %v542_v14 = vmul.f32 0.5, %v526_v31  ;;  %v636_v54 = vsub.f32 1.3836466, %v620_v24  ;;  %942 = vlog2.f32 %v1699_v37  ;;  %v2061_v15 = vld [vmem:[#allocation17_spill] sm:$0xff] }
  0x79   :  { %v670_v3 = vadd.f32 %v669_v39, %v630_v20  ;;  %v935_v29 = vpop.eup %934  ;;  %v529_v45 = vmul.f32 %v1644_v33, %v1644_v33  ;;  %v486_v58 = vmul.f32 0.6931472, %v933_v51  ;;  %v511_v44 = vsub.f32 -0.9189385, %v482_v38  ;;  %v2059_v39 = vld [vmem:[#allocation16_spill] sm:$0xff]  ;;  %v2064_v51 = vld [vmem:[#allocation13_spill] sm:$0xff] }
  0x7a   :  { %v937_v13 = vpop.eup %936  ;;  %v543_v12 = vmul.f32 0.5, %v527_v60  ;;  %v488_v48 = vmul.f32 0.6931472, %v935_v29  ;;  %944 = vlog2.f32 %v1701_v55  ;;  %v512_v19 = vsub.f32 -0.9189385, %v484_v9  ;;  %v2063_v60 = vld [vmem:[#allocation21_spill] sm:$0xff] }
  0x7b   :  { %v671_v25 = vadd.f32 %v670_v3, %v631_v17  ;;  %v530_v27 = vmul.f32 %v1649_v22, %v1649_v22  ;;  %v939_v42 = vpop.eup %938  ;;  %v544_v46 = vmul.f32 0.5, %v528_v8  ;;  %v557_v52 = vsub.f32 %v509_v18, %v541_v28  ;;  %v1874_v22 = vld [vmem:[%s1924_s4] sm:$0x1] }
  0x7c   :  { %v558_v37 = vsub.f32 %v510_v57, %v542_v14  ;;  %v941_v40 = vpop.eup %940  ;;  %v490_v34 = vmul.f32 0.6931472, %v937_v13  ;;  %946 = vlog2.f32 %v1703_v53  ;;  %v531_v33 = vmul.f32 %v1654_v11, %v1654_v11 }
  0x7d   :  { %v672_v63 = vadd.f32 %v671_v25, %v632_v47  ;;  %v513_v26 = vsub.f32 -0.9189385, %v486_v58  ;;  %v545_v32 = vmul.f32 0.5, %v529_v45  ;;  %v559_v55 = vsub.f32 %v511_v44, %v543_v12 }
  0x7e   :  { %v943_v61 = vpop.eup %942  ;;  %v492_v62 = vmul.f32 0.6931472, %v939_v42  ;;  %948 = vlog2.f32 %v2057_v16  ;;  %v532_v20 = vmul.f32 %v2058_v30, %v2058_v30  ;;  %v514_v53 = vsub.f32 -0.9189385, %v488_v48  ;;  %v2068_v30 = vld [vmem:[#allocation20_spill] sm:$0xff] }
  0x7f   :  { %v673_v10 = vadd.f32 %v672_v63, %v633_v4  ;;  %v546_v56 = vmul.f32 0.5, %v530_v27  ;;  %v560_v11 = vsub.f32 %v512_v19, %v544_v46  ;;  %v644_v49 = vadd.f32 %v558_v37, %v557_v52  ;;  %v2066_v19 = vld [vmem:[#allocation18_spill] sm:$0xff] }
  0x80   :  { %v945_v50 = vpop.eup %944  ;;  %v494_v17 = vmul.f32 0.6931472, %v941_v40  ;;  %950 = vlog2.f32 %v2059_v39  ;;  %v533_v43 = vmul.f32 %v2060_v0, %v2060_v0  ;;  %v689_v1 = vand.u32 2147483647, %v1874_v22  ;;  %v2069_v0 = vld [vmem:[#allocation22_spill] sm:$0xff] }
  0x81   :  { %v674_v41 = vadd.f32 %v673_v10, %v634_v35  ;;  %v515_v2 = vsub.f32 -0.9189385, %v490_v34  ;;  %v547_v47 = vmul.f32 0.5, %v531_v33  ;;  %v561_v3 = vsub.f32 %v513_v26, %v545_v32  ;;  %v2067_v34 = vld [vmem:[#allocation19_spill] sm:$0xff] }
  0x82   :  { %v645_v59 = vadd.f32 %v644_v49, %v559_v55  ;;  %v947_v4 = vpop.eup %946  ;;  %v496_v5 = vmul.f32 0.6931472, %v943_v61  ;;  %952 = vlog2.f32 %v2061_v15  ;;  %v534_v25 = vmul.f32 %v2062_v6, %v2062_v6 }
  0x83   :  { %v675_v21 = vadd.f32 %v674_v41, %v635_v36  ;;  %v690_v7 = vsub.f32 0.0, %v689_v1  ;;  %v516_v31 = vsub.f32 -0.9189385, %v492_v62  ;;  %v548_v24 = vmul.f32 0.5, %v532_v20 }
  0x84   :  { %v562_v35 = vsub.f32 %v514_v53, %v546_v56  ;;  %v646_v36 = vadd.f32 %v645_v59, %v560_v11  ;;  %v949_v63 = vpop.eup %948  ;;  %v498_v38 = vmul.f32 0.6931472, %v945_v50  ;;  %954 = vlog2.f32 %v2063_v60 }
  0x85   :  { %v676_v23 = vadd.f32 %v675_v21, %v636_v54  ;;  %v535_v9 = vmul.f32 %v2064_v51, %v2064_v51  ;;  %v691_v18 = vmul.f32 1.442695, %v690_v7  ;;  %v517_v8 = vsub.f32 -0.9189385, %v494_v17  ;;  %v2065_v54 = vld [vmem:[#allocation14_spill] sm:$0xff] }
  0x86   :  { %v549_v29 = vmul.f32 0.5, %v533_v43  ;;  %v563_v10 = vsub.f32 %v515_v2, %v547_v47  ;;  %v647_v57 = vadd.f32 %v646_v36, %v561_v3  ;;  %v951_v28 = vpop.eup %950  ;;  %v500_v14 = vmul.f32 0.6931472, %v947_v4 }
  0x87   :  { %744 = vadd.xlane.f32.xlu1 %v676_v23  ;;  %v536_v45 = vmul.f32 %v2065_v54, %v2065_v54  ;;  %956 = vpow2.f32 %v691_v18  ;;  %v518_v13 = vsub.f32 -0.9189385, %v496_v5  ;;  %v550_v41 = vmul.f32 0.5, %v534_v25 }
  0x88   :  { %v564_v58 = vsub.f32 %v516_v31, %v548_v24  ;;  %v648_v44 = vadd.f32 %v647_v57, %v562_v35  ;;  %v953_v12 = vpop.eup %952  ;;  %v502_v48 = vmul.f32 0.6931472, %v949_v63  ;;  %v537_v27 = vmul.f32 %v2066_v19, %v2066_v19 }
  0x89   :  { %v519_v42 = vsub.f32 -0.9189385, %v498_v38  ;;  %v551_v21 = vmul.f32 0.5, %v535_v9  ;;  %v565_v46 = vsub.f32 %v517_v8, %v549_v29  ;;  %v504_v40 = vmul.f32 0.6931472, %v951_v28 }
  0x8a   :  { %v649_v52 = vadd.f32 %v648_v44, %v563_v10  ;;  %v955_v37 = vpop.eup %954  ;;  %v538_v33 = vmul.f32 %v2067_v34, %v2067_v34  ;;  %v520_v23 = vsub.f32 -0.9189385, %v500_v14  ;;  %v552_v26 = vmul.f32 0.5, %v536_v45  ;;  %v684_v14 = vld [vmem:[%s1925_s5] sm:$0x1] }
  0x8b   :  { %v566_v32 = vsub.f32 %v518_v13, %v550_v41  ;;  %v506_v62 = vmul.f32 0.6931472, %v953_v12  ;;  %v521_v16 = vsub.f32 -0.9189385, %v502_v48  ;;  %v539_v20 = vmul.f32 %v2068_v30, %v2068_v30  ;;  %v682_v13 = vld [vmem:[%s1923_s3] sm:$0x1] }
  0x8c   :  { %v650_v55 = vadd.f32 %v649_v52, %v564_v58  ;;  %v553_v53 = vmul.f32 0.5, %v537_v27  ;;  %v567_v56 = vsub.f32 %v519_v42, %v551_v21  ;;  %v508_v17 = vmul.f32 0.6931472, %v955_v37 }
  0x8d   :  { %v957_v61 = vpop.eup %956  ;;  %v522_v39 = vsub.f32 -0.9189385, %v504_v40  ;;  %v540_v43 = vmul.f32 %v2069_v0, %v2069_v0  ;;  %v554_v1 = vmul.f32 0.5, %v538_v33  ;;  %v568_v2 = vsub.f32 %v520_v23, %v552_v26 }
  0x8e   :  { %v651_v11 = vadd.f32 %v650_v55, %v565_v46  ;;  %v693_v49 = vadd.f32 1.0, %v957_v61  ;;  %v696_v50 = vmul.f32 -0.5, %v957_v61  ;;  %v523_v3 = vsub.f32 -0.9189385, %v506_v62 }
  0x8f   :  { %v555_v4 = vmul.f32 0.5, %v539_v20  ;;  %v569_v5 = vsub.f32 %v521_v16, %v553_v53  ;;  %v699_v6 = vand.u32 2147483647, %v957_v61  ;;  %v524_v25 = vsub.f32 -0.9189385, %v508_v17 }
  0x90   :  { %v652_v47 = vadd.f32 %v651_v11, %v566_v32  ;;  %958 = vlog2.f32 %v693_v49  ;;  %v697_v59 = vadd.f32 1.0, %v696_v50  ;;  %v556_v7 = vmul.f32 0.5, %v540_v43 }
  0x91   :  { %v570_v31 = vsub.f32 %v522_v39, %v554_v1  ;;  %v571_v63 = vsub.f32 %v523_v3, %v555_v4  ;;  %v686_v60 = vmax.f32 %v1874_v22, 0.0  ;;  %vm700_vm7 = vcmp.lt.f32.partialorder %v699_v6, 0.0004427343 }
  0x92   :  { %v653_v15 = vadd.f32 %v652_v47, %v567_v56  ;;  %v698_v35 = vmul.f32 %v957_v61, %v697_v59  ;;  %v572_v9 = vsub.f32 %v524_v25, %v556_v7  ;;  %vm687_vm9 = vcmp.ne.f32.partialorder %v1874_v22, %v1874_v22 }
  0x93   :  { %vm685_vm15 = vcmp.gt.f32.partialorder %v1874_v22, 20.0  ;;  %v712_v44 = vmul.f32 %v684_v14, %v684_v14  ;;  %vm729_vm11 = vcmask 1040384  }
  0x94   :  { %v654_v24 = vadd.f32 %v653_v15, %v568_v2 }
  0x95   :  { %v713_v42 = vmul.f32 0.5, %v712_v44 }
  0x96   :  { %v959_v36 = vpop.eup %958  ;;  %v655_v38 = vadd.f32 %v654_v24, %v569_v5 }
  0x97   :  { %v695_v51 = vmul.f32 0.6931472, %v959_v36 }
  0x98   :  { %v656_v18 = vadd.f32 %v655_v38, %v570_v31 }
  0x99   :  { %v701_v8 = vsel %vm700_vm7, %v698_v35, %v695_v51 }
  0x9a   :  { %v657_v29 = vadd.f32 %v656_v18, %v571_v63  ;;  %v702_v10 = vadd.f32 %v701_v8, %v686_v60 }
  0x9c   :  { %v658_v57 = vadd.f32 %v657_v29, %v572_v9  ;;  %v703_v28 = vsel %vm687_vm9, %v1874_v22, %v702_v10 }
  0x9d   :  { %v704_v54 = vsel %vm685_vm15, %v1874_v22, %v703_v28 }
  0x9e   :  { %720 = vadd.xlane.f32.xlu0 %v658_v57  ;;  %v705_v45 = vadd.f32 1e-06, %v704_v54 }
  0xa0   :  { %v706_v41 = vmul.f32 %v705_v45, %v684_v14  ;;  %960 = vlog2.f32 %v705_v45 }
  0xa2   :  { %v707_v58 = vadd.f32 %v706_v41, %v682_v13 }
  0xa4   :  { %708 = vst [vmem:[%s1927_s7] sm:$0x1] %v707_v58  ;;  %v715_v12 = vmul.f32 10.0, %v707_v58  ;;  %s775_s7 = sshll.u32 %s1928_s8, 4  ;;  %s776_s7 = int_to_ptr.hbm [resolvable:$true] %s775_s7 }
  0xa6   :  { %v961_v48 = vpop.eup %960  ;;  %v716_v19 = vmul.f32 %v715_v12, %v715_v12 }
  0xa7   :  { %v710_v27 = vmul.f32 0.6931472, %v961_v48 }
  0xa8   :  { %v717_v22 = vmul.f32 0.5, %v716_v19 }
  0xa9   :  { %v711_v21 = vsub.f32 -0.9189385, %v710_v27 }
  0xaa   :  { %v718_v46 = vsub.f32 1.3836466, %v717_v22 }
  0xab   :  { %v714_v52 = vsub.f32 %v711_v21, %v713_v42 }
  0xac   :  { %v753_v37 = vsel %vm729_vm11, %v718_v46, 0.0 }
  0xad   :  { %754 = vadd.xlane.f32.xlu1 %v753_v37  ;;  %v730_v40 = vsel %vm729_vm11, %v714_v52, 0.0 }
  0xae   :  { %731 = vadd.xlane.f32.xlu0 %v730_v40 }
  0xfa   :  { %v745_v26 = vpop.xlane.xlu1 %744 }
  0xfb   :  { %v746_v61 = vrot.slane %v745_v26, 4 }
  0xfd   :  { %v747_v30 = vadd.f32 %v746_v61, %v745_v26 }
  0xff   :  { %v748_v53 = vrot.slane %v747_v30, 2 }
 0x101   :  { %v749_v0 = vadd.f32 %v748_v53, %v747_v30 }
 0x103   :  { %v750_v47 = vrot.slane %v749_v0, 1 }
 0x105   :  { %v751_v15 = vadd.f32 %v750_v47, %v749_v0 }
 0x111   :  { %v721_v34 = vpop.xlane.xlu0 %720 }
 0x112   :  { %v722_v33 = vrot.slane %v721_v34, 4 }
 0x114   :  { %v723_v23 = vadd.f32 %v722_v33, %v721_v34 }
 0x116   :  { %v724_v32 = vrot.slane %v723_v23, 2 }
 0x118   :  { %v725_v55 = vadd.f32 %v724_v32, %v723_v23 }
 0x11a   :  { %v726_v62 = vrot.slane %v725_v55, 1 }
 0x11c   :  { %v727_v16 = vadd.f32 %v726_v62, %v725_v55 }
 0x11e   :  { %850 = vpush %v727_v16 }
 0x120   :  { %v755_v20 = vpop.xlane.xlu1 %754 }
 0x121   :  { %v756_v56 = vrot.slane %v755_v20, 4  ;;  %v732_v11 = vpop.xlane.xlu0 %731 }
 0x122   :  { %v733_v49 = vrot.slane %v732_v11, 4 }
 0x123   :  { %v757_v50 = vadd.f32 %v756_v56, %v755_v20 }
 0x124   :  { %v734_v17 = vadd.f32 %v733_v49, %v732_v11 }
 0x125   :  { %v758_v39 = vrot.slane %v757_v50, 2 }
 0x126   :  { %v735_v43 = vrot.slane %v734_v17, 2 }
 0x127   :  { %v759_v1 = vadd.f32 %v758_v39, %v757_v50 }
 0x128   :  { %v736_v2 = vadd.f32 %v735_v43, %v734_v17 }
 0x129   :  { %v760_v3 = vrot.slane %v759_v1, 1 }
 0x12a   :  { %v737_v59 = vrot.slane %v736_v2, 1 }
 0x12b   :  { %v761_v5 = vadd.f32 %v760_v3, %v759_v1 }
 0x12c   :  { %v738_v4 = vadd.f32 %v737_v59, %v736_v2 }
 0x12e   :  { %852 = vpush %v738_v4 }
 0x12f   :  { %854 = vpush %v751_v15 }
 0x130   :  { %856 = vpush %v761_v5 }
 0x14f   :  { %s851_s15 = spop %850 }
 0x15f   :  { %s853_s0 = spop %852 }
 0x160   :  { %s740_s19 = sadd.f32 %s853_s0, %s851_s15  ;;  %s855_s1 = spop %854 }
 0x161   :  { %s857_s20 = spop %856 }
 0x162   :  { %742 = sst [smem:[#allocation4]] %s740_s19 }
 0x163   :  { %s763_s2 = sadd.f32 %s857_s20, %s855_s1 }
 0x164   :  { %778 = dma.smem_to_hbm %s990_s21, 16, %s776_s7, [#allocation5]  }
 0x165   :  { %765 = sst [smem:[#allocation6]] %s763_s2 }
 0x166   :  { %787 = dma.smem_to_hbm %s991_s22, 16, %s785_s18, [#allocation7]  }
 0x167   :  { %986 = dma.done.wait [#allocation5], 16  }
 0x168   :  { %987 = vsyncadd [#allocation5], 4294967280 }
 0x169   :  { %988 = dma.done.wait [#allocation7], 16  }
 0x16a   :  { %989 = vsyncadd [#allocation7], 4294967280 }
 0x16b   :  { %800 = sfence }
 0x16c   :  { %801 = vsyncpa [#allocation5], 1 }
 0x16d   :  { %802 = vsyncpa [#allocation7], 1 }

</bundles_post_ra>
